<compile_context>
chip_gen: v7x
topology: tpu7x:2x2x1
jax: 0.10.0
libtpu: 0.0.40
codegen_flags: <defaults>
</compile_context>

<pallas_src>
import functools

import jax
import jax.numpy as jnp
from jax.experimental import pallas as pl
from jax.experimental.pallas import tpu as pltpu


# ----------------------------------------------------------------------------
# Fused Pallas kernel: two affine blendshape evaluations per grid step
#   fl_out = fl_bias + fl_coeffs @ fl_dirs      (x90 + landmarks folded in)
#   mh_out = mh_bias + mh_coeffs @ mh_dirs      (scale/trans folded by wrapper)
# ----------------------------------------------------------------------------
def _fused_blend_kernel(fl_coeffs_ref, fl_dirs_ref, fl_bias_ref,
                        mh_coeffs_ref, mh_dirs_ref, mh_bias_ref,
                        fl_out_ref, mh_out_ref):
    # coeffs: (Bp, K) bf16   dirs: (K, TD) bf16   bias: (1, TD) f32   out: (Bp, TD) f32
    fl_acc = jnp.dot(fl_coeffs_ref[...], fl_dirs_ref[...],
                     preferred_element_type=jnp.float32)
    fl_out_ref[...] = fl_bias_ref[...] + fl_acc

    mh_acc = jnp.dot(mh_coeffs_ref[...], mh_dirs_ref[...],
                     preferred_element_type=jnp.float32)
    mh_out_ref[...] = mh_bias_ref[...] + mh_acc


# ----------------------------------------------------------------------------
# Generation-aware VMEM budgeting & grid selection
# ----------------------------------------------------------------------------
def _tpu_memory_config():
    """Returns (tile_budget_bytes, vmem_limit_bytes, prefer_multi_tiles)."""
    vmem_cap = 128 * 1024 * 1024
    try:
        info = pltpu.get_tpu_info()
        vmem_cap = int(getattr(info, "vmem_capacity_bytes", vmem_cap))
    except Exception:
        pass
    prefer_multi = False
    try:
        kind = jax.devices()[0].device_kind.lower()
        # v7x has 2 TensorCores per chip: a >=2-tile parallel grid keeps both busy.
        prefer_multi = ("v7" in kind) or ("7x" in kind)
    except Exception:
        pass
    budget = max(8 * 1024 * 1024, vmem_cap // 2)
    limit = max(32 * 1024 * 1024,
                min(vmem_cap - 8 * 1024 * 1024, (vmem_cap * 3) // 4))
    return budget, int(limit), prefer_multi


def _pick_grid(d_list, k_list, b_rows, dirs_itemsize, budget, prefer_multi):
    """Number of D-tiles G such that every D in d_list splits into G lane-dense
    (multiple-of-128) tiles and the double-buffered working set fits budget."""
    max_g = min(d // 128 for d in d_list)
    cands = [g for g in range(1, max_g + 1)
             if all(d % (128 * g) == 0 for d in d_list)]
    if not cands:
        return 1

    def vmem_bytes(g):
        total = 0
        for d, k in zip(d_list, k_list):
            td = d // g
            total += 2 * (k * td * dirs_itemsize   # dirs   (double-buffered)
                          + td * 4                 # bias   (f32)
                          + b_rows * td * 4)       # out    (f32)
            total += 2 * b_rows * k * 2            # coeffs (bf16)
        return total

    fits = [g for g in cands if vmem_bytes(g) <= budget]
    if not fits:
        return max(cands)
    if prefer_multi:
        multi = [g for g in fits if g >= 2]
        if multi:
            return min(multi)          # >=2 tiles, largest that fits
    return min(fits)                   # single-TC: largest tiles that fit


# ----------------------------------------------------------------------------
# Wrapper: one pallas_call for both sub-models
# ----------------------------------------------------------------------------
def fused_blendshape(fl_coeffs, fl_dirs, fl_bias, mh_coeffs, mh_dirs, mh_bias):
    """(fl_bias + fl_coeffs@fl_dirs, mh_bias + mh_coeffs@mh_dirs) in one kernel.

    coeffs: (B, K) f32 (padded & bf16-cast here)   dirs: (K, D) bf16
    bias  : (1, D) f32.   Returns two (B, D) f32 arrays.
    """
    B = fl_coeffs.shape[0]
    Bp = -(-B // 8) * 8                               # full (8,128) output tiles

    def prep(c, k_target):
        c = c.astype(jnp.float32)
        c = jnp.pad(c, ((0, Bp - B), (0, k_target - c.shape[1])))
        return c.astype(jnp.bfloat16)                 # cast once, outside kernel

    K_fl, D_fl = fl_dirs.shape
    K_mh, D_mh = mh_dirs.shape
    fl_c = prep(fl_coeffs, K_fl)
    mh_c = prep(mh_coeffs, K_mh)
    fl_bias = fl_bias.astype(jnp.float32)
    mh_bias = mh_bias.astype(jnp.float32)

    budget, vmem_limit, prefer_multi = _tpu_memory_config()
    G = _pick_grid((D_fl, D_mh), (K_fl, K_mh), Bp,
                   fl_dirs.dtype.itemsize, budget, prefer_multi)
    td_fl = D_fl // G
    td_mh = D_mh // G

    call = pl.pallas_call(
        _fused_blend_kernel,
        out_shape=(jax.ShapeDtypeStruct((Bp, D_fl), jnp.float32),
                   jax.ShapeDtypeStruct((Bp, D_mh), jnp.float32)),
        grid_spec=pltpu.PrefetchScalarGridSpec(
            num_scalar_prefetch=0,
            grid=(G,),
            in_specs=[
                pl.BlockSpec((Bp, K_fl), lambda j: (0, 0)),     # fl coeffs (invariant)
                pl.BlockSpec((K_fl, td_fl), lambda j: (0, j)),  # fl dirs
                pl.BlockSpec((1, td_fl), lambda j: (0, j)),     # fl bias
                pl.BlockSpec((Bp, K_mh), lambda j: (0, 0)),     # mh coeffs (invariant)
                pl.BlockSpec((K_mh, td_mh), lambda j: (0, j)),  # mh dirs
                pl.BlockSpec((1, td_mh), lambda j: (0, j)),     # mh bias
            ],
            out_specs=[
                pl.BlockSpec((Bp, td_fl), lambda j: (0, j)),
                pl.BlockSpec((Bp, td_mh), lambda j: (0, j)),
            ],
        ),
        compiler_params=pltpu.CompilerParams(
            dimension_semantics=("parallel",),
            vmem_limit_bytes=vmem_limit),
    )
    fl_out, mh_out = call(fl_c, fl_dirs, fl_bias, mh_c, mh_dirs, mh_bias)
    return fl_out[:B], mh_out[:B]


# ----------------------------------------------------------------------------
# Model definition (parameters + synthetic fused FLAME / MetaHuman bases)
# ----------------------------------------------------------------------------
N_SHAPE = 300
N_EXP = 100
POSE_DIM = 15          # global(3) + neck(3) + jaw(3) + eyes(6); jaw at [6:9]
N_MH_COEFF = 35
N_LMK = 68


def build_model(key, obj_count, nv_flame, nv_mh):
    keys = jax.random.split(key, 6)

    def lmk_regressor(k, nv):
        w = jax.random.uniform(k, (N_LMK, nv), jnp.float32)
        return w / jnp.sum(w, axis=1, keepdims=True)        # barycentric-ish

    def fuse_f32(dirs3, template, lmk_reg):
        """Concatenate vertex basis and landmark basis along D (f32, unpadded)."""
        k_dim, nv = dirs3.shape[0], template.shape[0]
        dirs_v = dirs3.reshape(k_dim, nv * 3)
        bias_v = template.reshape(1, nv * 3)
        dirs_l = jnp.einsum('kvc,lv->klc', dirs3, lmk_reg).reshape(k_dim, N_LMK * 3)
        bias_l = jnp.einsum('vc,lv->lc', template, lmk_reg).reshape(1, N_LMK * 3)
        return (jnp.concatenate([dirs_v, dirs_l], axis=1),
                jnp.concatenate([bias_v, bias_l], axis=1))

    def to_kernel(dirs, bias, scale_fold):
        """Fold a static scale, pad K to a multiple of 16 (bf16 sublane packing)
        and D to a multiple of 512 (lane-dense, G in {1,2,4} available),
        cast dirs to bf16 (bias stays f32)."""
        dirs = dirs * scale_fold
        bias = bias * scale_fold
        k_dim, d = dirs.shape
        k_pad = -(-k_dim // 16) * 16
        d_pad = -(-d // 512) * 512
        dirs = jnp.pad(dirs, ((0, k_pad - k_dim), (0, d_pad - d))).astype(jnp.bfloat16)
        bias = jnp.pad(bias, ((0, 0), (0, d_pad - d))).astype(jnp.float32)
        return dirs, bias

    # ---- synthetic FLAME blendshape model (x90 output scale folded in) ----
    flame_template = jax.random.normal(keys[0], (nv_flame, 3), jnp.float32) * 0.1
    flame_dirs3 = jax.random.normal(
        keys[1], (N_SHAPE + N_EXP + POSE_DIM, nv_flame, 3), jnp.float32) * 0.01
    L_fl = lmk_regressor(keys[2], nv_flame)
    fl_dirs_f32, fl_bias_f32 = fuse_f32(flame_dirs3, flame_template, L_fl)
    fl_dirs, fl_bias = to_kernel(fl_dirs_f32, fl_bias_f32, 90.0)

    # ---- synthetic MetaHuman blendshape model (scale stays runtime) -------
    mh_template = jax.random.normal(keys[3], (nv_mh, 3), jnp.float32) * 0.1
    mh_dirs3 = jax.random.normal(
        keys[4], (N_MH_COEFF, nv_mh, 3), jnp.float32) * 0.01
    L_mh = lmk_regressor(keys[5], nv_mh)
    mh_dirs_f32, mh_bias_f32 = fuse_f32(mh_dirs3, mh_template, L_mh)
    mh_dirs, mh_bias = to_kernel(mh_dirs_f32, mh_bias_f32, 1.0)

    # ---- learnable parameters, exactly as in MyModel.__init__ --------------
    params = dict(
        shape_embedding1=jnp.zeros((1, N_SHAPE), jnp.float32),
        exp_embeddings1=jnp.zeros((1, N_EXP), jnp.float32),
        jaw_embeddings1=jnp.zeros((1, 3), jnp.float32),
        exp_coeffs=-jnp.ones((obj_count, N_MH_COEFF), jnp.float32) * 30.0,
        last=jnp.zeros((1, N_MH_COEFF), jnp.float32),
        mh_scale=jnp.array([80.0], jnp.float32),
        mh_trans=jnp.zeros((1, 1, 3), jnp.float32),
    )
    consts = (fl_dirs, fl_bias, mh_dirs, mh_bias)                  # kernel (bf16 dirs)
    ref_consts = (fl_dirs_f32, fl_bias_f32, mh_dirs_f32, mh_bias_f32)  # true f32 reference
    return params, consts, ref_consts


# ----------------------------------------------------------------------------
# Forward pass (matches MyModel.forward semantics)
# ----------------------------------------------------------------------------
@functools.partial(jax.jit, static_argnames=('nv_flame', 'nv_mh'))
def forward(params, consts, exp_embeddings, pose_params, idx, *, nv_flame, nv_mh):
    fl_dirs, fl_bias, mh_dirs, mh_bias = consts
    B = idx.shape[0]

    # exp_embeddings += exp_embeddings1 ; pose_params[:, 6:9] += jaw_embeddings1
    exp = exp_embeddings + params['exp_embeddings1']
    pose = pose_params.at[:, 6:9].add(params['jaw_embeddings1'])

    # FLAME(shape, exp, pose) coefficients (x90 already folded into the basis).
    shape_b = jnp.broadcast_to(params['shape_embedding1'], (B, N_SHAPE))
    fl_coeffs = jnp.concatenate([shape_b, exp, pose], axis=1)      # (B, 415)

    # MetaHuman(sigmoid(exp_coeffs[idx]) + last); (+ trans) * mh_scale folded:
    #   (template + c@dirs + trans)*s == (template+trans)*s + (c*s)@dirs
    mh_coeffs = jax.nn.sigmoid(params['exp_coeffs'][idx]) + params['last']
    scale = params['mh_scale'][0]
    trans = params['mh_trans'].reshape(1, 3)
    d_mv, d_ml = 3 * nv_mh, 3 * N_LMK
    d_mh_total = mh_dirs.shape[1]
    trans_pattern = jnp.concatenate(
        [jnp.tile(trans, (1, nv_mh)),
         jnp.tile(trans, (1, N_LMK)),
         jnp.zeros((1, d_mh_total - d_mv - d_ml), jnp.float32)], axis=1)
    mh_bias_t = (mh_bias + trans_pattern) * scale
    mh_coeffs_s = mh_coeffs * scale

    # Single fused kernel launch for both sub-models.
    fl_out, mh_out = fused_blendshape(fl_coeffs, fl_dirs, fl_bias,
                                      mh_coeffs_s, mh_dirs, mh_bias_t)

    d_fv = 3 * nv_flame
    fl_verts = fl_out[:, :d_fv].reshape(B, nv_flame, 3)
    fl_lmk = fl_out[:, d_fv:d_fv + 3 * N_LMK].reshape(B, N_LMK, 3)
    mh_verts = mh_out[:, :d_mv].reshape(B, nv_mh, 3)
    mh_lmk = mh_out[:, d_mv:d_mv + d_ml].reshape(B, N_LMK, 3)
    return fl_verts, fl_lmk, mh_verts, mh_lmk


# ----------------------------------------------------------------------------
# Pure-JAX float32 reference (original op ordering, no bf16) for correctness
# ----------------------------------------------------------------------------
def reference(params, ref_consts, exp_embeddings, pose_params, idx, nv_flame, nv_mh):
    fl_dirs, fl_bias, mh_dirs, mh_bias = ref_consts               # all float32
    B = idx.shape[0]
    exp = exp_embeddings + params['exp_embeddings1']
    pose = pose_params.at[:, 6:9].add(params['jaw_embeddings1'])
    shape_b = jnp.broadcast_to(params['shape_embedding1'], (B, N_SHAPE))
    fl_coeffs = jnp.concatenate([shape_b, exp, pose], axis=1)
    fl_out = (fl_bias + fl_coeffs @ fl_dirs) * 90.0
    d_fv = 3 * nv_flame
    fl_verts = fl_out[:, :d_fv].reshape(B, nv_flame, 3)
    fl_lmk = fl_out[:, d_fv:].reshape(B, N_LMK, 3)

    mh_coeffs = jax.nn.sigmoid(params['exp_coeffs'][idx]) + params['last']
    mh_out = mh_bias + mh_coeffs @ mh_dirs
    trans = params['mh_trans'].reshape(1, 1, 3)
    scale = params['mh_scale'][0]
    d_mv = 3 * nv_mh
    mh_verts = (mh_out[:, :d_mv].reshape(B, nv_mh, 3) + trans) * scale
    mh_lmk = (mh_out[:, d_mv:].reshape(B, N_LMK, 3) + trans) * scale
    return fl_verts, fl_lmk, mh_verts, mh_lmk


# ----------------------------------------------------------------------------
if __name__ == "__main__":
    key = jax.random.PRNGKey(0)
    k_model, k_exp, k_pose = jax.random.split(key, 3)

    OBJ_COUNT = 6
    B = 4
    NV_FLAME = 384        # fused D = 1152 + 204 -> padded 1536
    NV_MH = 256           # fused D = 768 + 204 -> padded 1024

    params, consts, ref_consts = build_model(k_model, OBJ_COUNT, NV_FLAME, NV_MH)

    exp_embeddings = jax.random.normal(k_exp, (B, N_EXP), jnp.float32) * 0.1
    pose_params = jax.random.normal(k_pose, (B, POSE_DIM), jnp.float32) * 0.1
    idx = jnp.array([0, 2, 3, 5], dtype=jnp.int32)

    outs = forward(params, consts, exp_embeddings, pose_params, idx,
                   nv_flame=NV_FLAME, nv_mh=NV_MH)
    outs = jax.block_until_ready(outs)

    fl_verts, fl_lmk, mh_verts, mh_lmk = outs
    assert fl_verts.shape == (B, NV_FLAME, 3)
    assert fl_lmk.shape == (B, N_LMK, 3)
    assert mh_verts.shape == (B, NV_MH, 3)
    assert mh_lmk.shape == (B, N_LMK, 3)
    assert all(bool(jnp.all(jnp.isfinite(o))) for o in outs)

    refs = reference(params, ref_consts, exp_embeddings, pose_params, idx,
                     NV_FLAME, NV_MH)
    for got, ref in zip(outs, refs):
        # bf16 bases/coeffs vs true f32 reference: absolute + norm-relative check
        assert bool(jnp.allclose(got, ref, rtol=1e-2, atol=2e-2)), \
            float(jnp.max(jnp.abs(got - ref)))
        rel = float(jnp.max(jnp.abs(got - ref)) / (jnp.max(jnp.abs(ref)) + 1e-6))
        assert rel < 2e-3, rel

    print("KERNEL_OK")
</pallas_src>

<mosaic_0001>
module attributes {stable_mosaic.version = 11 : i64} {
  func.func @_fused_blend_kernel(%arg0: i32, %arg1: memref<8x416xbf16, #tpu.memory_space<vmem>>, %arg2: memref<416x1536xbf16, #tpu.memory_space<vmem>>, %arg3: memref<1x1536xf32, #tpu.memory_space<vmem>>, %arg4: memref<8x48xbf16, #tpu.memory_space<vmem>>, %arg5: memref<48x1024xbf16, #tpu.memory_space<vmem>>, %arg6: memref<1x1024xf32, #tpu.memory_space<vmem>>, %arg7: memref<8x1536xf32, #tpu.memory_space<vmem>>, %arg8: memref<8x1024xf32, #tpu.memory_space<vmem>>) attributes {dimension_semantics = [#tpu.dimension_semantics<parallel>], iteration_bounds = array<i64: 1>, scalar_prefetch = 0 : i64, scratch_operands = 0 : i64, tpu.core_type = #tpu.core_type<tc>, window_params = [{pipeline_mode = #tpu.pipeline_mode<synchronous>, transform_indices = @transform_0, window_bounds = array<i64: 8, 416>}, {transform_indices = @transform_1, window_bounds = array<i64: 416, 1536>}, {transform_indices = @transform_2, window_bounds = array<i64: 1, 1536>}, {pipeline_mode = #tpu.pipeline_mode<synchronous>, transform_indices = @transform_3, window_bounds = array<i64: 8, 48>}, {transform_indices = @transform_4, window_bounds = array<i64: 48, 1024>}, {transform_indices = @transform_5, window_bounds = array<i64: 1, 1024>}, {transform_indices = @transform_6, window_bounds = array<i64: 8, 1536>}, {transform_indices = @transform_7, window_bounds = array<i64: 8, 1024>}]} {
    %c0 = arith.constant 0 : index
    %c0_0 = arith.constant 0 : index
    %0 = vector.load %arg1[%c0, %c0_0] : memref<8x416xbf16, #tpu.memory_space<vmem>>, vector<8x416xbf16>
    %c0_1 = arith.constant 0 : index
    %c0_2 = arith.constant 0 : index
    %1 = vector.load %arg2[%c0_1, %c0_2] : memref<416x1536xbf16, #tpu.memory_space<vmem>>, vector<416x1536xbf16>
    %cst = arith.constant dense<0.000000e+00> : vector<8x1536xf32>
    %2 = tpu.matmul %0, %1, %cst {dimension_numbers = #tpu.dot_dimension_numbers<[1], [0], [0], [1], [0, 0, 1, 1], [], []>} : vector<8x416xbf16>, vector<416x1536xbf16>, vector<8x1536xf32> -> vector<8x1536xf32>
    %c0_3 = arith.constant 0 : index
    %c0_4 = arith.constant 0 : index
    %3 = vector.load %arg3[%c0_3, %c0_4] : memref<1x1536xf32, #tpu.memory_space<vmem>>, vector<1x1536xf32>
    %4 = vector.broadcast %3 : vector<1x1536xf32> to vector<8x1536xf32>
    %5 = arith.addf %4, %2 : vector<8x1536xf32>
    %c0_5 = arith.constant 0 : index
    %c0_6 = arith.constant 0 : index
    %6 = vector.load %arg7[%c0_5, %c0_6] : memref<8x1536xf32, #tpu.memory_space<vmem>>, vector<8x1536xf32>
    tpu.vector_store %arg7[%c0_5, %c0_6], %5 {strides = array<i32>} : memref<8x1536xf32, #tpu.memory_space<vmem>>, vector<8x1536xf32>,
    %c0_7 = arith.constant 0 : index
    %c0_8 = arith.constant 0 : index
    %7 = vector.load %arg4[%c0_7, %c0_8] : memref<8x48xbf16, #tpu.memory_space<vmem>>, vector<8x48xbf16>
    %c0_9 = arith.constant 0 : index
    %c0_10 = arith.constant 0 : index
    %8 = vector.load %arg5[%c0_9, %c0_10] : memref<48x1024xbf16, #tpu.memory_space<vmem>>, vector<48x1024xbf16>
    %cst_11 = arith.constant dense<0.000000e+00> : vector<8x1024xf32>
    %9 = tpu.matmul %7, %8, %cst_11 {dimension_numbers = #tpu.dot_dimension_numbers<[1], [0], [0], [1], [0, 0, 1, 1], [], []>} : vector<8x48xbf16>, vector<48x1024xbf16>, vector<8x1024xf32> -> vector<8x1024xf32>
    %c0_12 = arith.constant 0 : index
    %c0_13 = arith.constant 0 : index
    %10 = vector.load %arg6[%c0_12, %c0_13] : memref<1x1024xf32, #tpu.memory_space<vmem>>, vector<1x1024xf32>
    %11 = vector.broadcast %10 : vector<1x1024xf32> to vector<8x1024xf32>
    %12 = arith.addf %11, %9 : vector<8x1024xf32>
    %c0_14 = arith.constant 0 : index
    %c0_15 = arith.constant 0 : index
    %13 = vector.load %arg8[%c0_14, %c0_15] : memref<8x1024xf32, #tpu.memory_space<vmem>>, vector<8x1024xf32>
    tpu.vector_store %arg8[%c0_14, %c0_15], %12 {strides = array<i32>} : memref<8x1024xf32, #tpu.memory_space<vmem>>, vector<8x1024xf32>,
    return
  }
  func.func @transform_0(%arg0: i32) -> (i32, i32) {
    %c0_i32 = arith.constant 0 : i32
    %c0_i32_0 = arith.constant 0 : i32
    %c0_i32_1 = arith.constant 0 : i32
    return %c0_i32, %c0_i32_0 : i32, i32
  }
  func.func @transform_1(%arg0: i32) -> (i32, i32) {
    %c0_i32 = arith.constant 0 : i32
    %c0_i32_0 = arith.constant 0 : i32
    return %c0_i32, %arg0 : i32, i32
  }
  func.func @transform_2(%arg0: i32) -> (i32, i32) {
    %c0_i32 = arith.constant 0 : i32
    %c0_i32_0 = arith.constant 0 : i32
    return %c0_i32, %arg0 : i32, i32
  }
  func.func @transform_3(%arg0: i32) -> (i32, i32) {
    %c0_i32 = arith.constant 0 : i32
    %c0_i32_0 = arith.constant 0 : i32
    %c0_i32_1 = arith.constant 0 : i32
    return %c0_i32, %c0_i32_0 : i32, i32
  }
  func.func @transform_4(%arg0: i32) -> (i32, i32) {
    %c0_i32 = arith.constant 0 : i32
    %c0_i32_0 = arith.constant 0 : i32
    return %c0_i32, %arg0 : i32, i32
  }
  func.func @transform_5(%arg0: i32) -> (i32, i32) {
    %c0_i32 = arith.constant 0 : i32
    %c0_i32_0 = arith.constant 0 : i32
    return %c0_i32, %arg0 : i32, i32
  }
  func.func @transform_6(%arg0: i32) -> (i32, i32) {
    %c0_i32 = arith.constant 0 : i32
    %c0_i32_0 = arith.constant 0 : i32
    return %c0_i32, %arg0 : i32, i32
  }
  func.func @transform_7(%arg0: i32) -> (i32, i32) {
    %c0_i32 = arith.constant 0 : i32
    %c0_i32_0 = arith.constant 0 : i32
    return %c0_i32, %arg0 : i32, i32
  }
}

</mosaic_0001>

<bundles_post_ra>
// kernel: forward.1
= control target key start
LH: loop header
LB: loop body
LE: loop exit
PB: predicated region body
PF: predicated region fallthrough
CT: control target
= control target key end

     0   :  { %13 = vsyncpa [#allocation3], 0  ;;  %s4252_s0 = inlined_call_operand.hbm [shape: bf16[8,416], index: 0, kind: input, shape index: {}]   ;;  %s4253_s1 = inlined_call_operand.hbm [shape: bf16[416,1536], index: 1, kind: input, shape index: {}]   ;;  %s4254_s2 = inlined_call_operand.hbm [shape: f32[1,1536], index: 2, kind: input, shape index: {}]   ;;  %s4255_s3 = inlined_call_operand.hbm [shape: bf16[8,48], index: 3, kind: input, shape index: {}]   ;;  %s4256_s4 = inlined_call_operand.hbm [shape: bf16[48,1024], index: 4, kind: input, shape index: {}]   ;;  %s4257_s5 = inlined_call_operand.hbm [shape: f32[1,1024], index: 5, kind: input, shape index: {}]   ;;  %s4258_s6 = inlined_call_operand.hbm [shape: f32[8,1536], index: 6, kind: output, shape index: {0}]   ;;  %s4259_s7 = inlined_call_operand.hbm [shape: f32[8,1024], index: 7, kind: output, shape index: {1}]  }
   0x1   :  { %14 = vsyncpa [#allocation6], 0 }
   0x2   :  { %15 = vsyncpa [#allocation9], 0 }
   0x3   :  { %16 = vsyncpa [#allocation12], 0 }
   0x4   :  { %17 = vsyncpa [#allocation4], 0 }
   0x5   :  { %18 = vsyncpa [#allocation15], 0  ;;  %s3999_s24 = smov [#allocation5]   ;;  %s3811_s28 = scalar_lea.hbm %s4253_s1, 39936 }
   0x6   :  { %s34_s25 = sshll.u32 %s3999_s24, 4  ;;  %p3812_p0 = scmp.ne.s32.totalorder %s4253_s1, %s3811_s28  ;;  %s35_s25 = int_to_ptr.vmem [resolvable:$true] %s34_s25 }
   0x7   :  { %p3815_p1 = scmp.lt.u32.totalorder %s3811_s28, %s4253_s1 }
   0x9   :  { %p3817_p2 = pnand %p3815_p1, %p3812_p0 }
   0xb   :  { %3820 = shalt.err (!%p3817_p2)
}
   0xc   :  { %s3821_s10 = scalar_lea.vmem %s35_s25, 39936  ;;  %p3826_p4 = scmp.lt.s32.totalorder %s35_s25, %s35_s25 }
   0xd   :  { %p3822_p3 = scmp.ne.s32.totalorder %s35_s25, %s3821_s10  ;;  %p3827_p5 = scmp.lt.s32.totalorder %s3821_s10, %s3821_s10 }
   0xf   :  { %p3828_p6 = por %p3827_p5, %p3826_p4 }
  0x11   :  { %p3829_p7 = pnand %p3828_p6, %p3822_p3 }
  0x13   :  { %3832 = shalt.err (!%p3829_p7)
}
  0x14   :  { %s4000_s11 = smov 768   ;;  %s4001_s12 = smov 48  }
  0x15   :  { %40 = dma.hbm_to_vmem [thread:$0]  %s4253_s1, 39936, %s35_s25, [#allocation6], %s4000_s11, %s4000_s11, %s4001_s12  }
  0x16   :  { %s4002_s15 = smov [#allocation8]   ;;  %s4003_s17 = smov [#allocation2]  }
  0x17   :  { %s57_s16 = sshll.u32 %s4002_s15, 4  ;;  %s25_s18 = sshll.u32 %s4003_s17, 4  ;;  %s58_s16 = int_to_ptr.vmem [resolvable:$true] %s57_s16  ;;  %s26_s18 = int_to_ptr.vmem [resolvable:$true] %s25_s18 }
  0x18   :  { %s3833_s21 = scalar_lea.hbm %s4255_s3, 64 }
  0x19   :  { %p3834_p8 = scmp.ne.s32.totalorder %s4255_s3, %s3833_s21  ;;  %p3837_p9 = scmp.lt.u32.totalorder %s3833_s21, %s4255_s3 }
  0x1b   :  { %p3839_p10 = pnand %p3837_p9, %p3834_p8 }
  0x1d   :  { %3842 = shalt.err (!%p3839_p10)
}
  0x1e   :  { %s3843_s1 = scalar_lea.vmem %s58_s16, 64  ;;  %p3848_p12 = scmp.lt.s32.totalorder %s58_s16, %s58_s16 }
  0x1f   :  { %p3844_p11 = scmp.ne.s32.totalorder %s58_s16, %s3843_s1  ;;  %p3849_p13 = scmp.lt.s32.totalorder %s3843_s1, %s3843_s1 }
  0x21   :  { %p3850_p0 = por %p3849_p13, %p3848_p12 }
  0x23   :  { %p3851_p1 = pnand %p3850_p0, %p3844_p11 }
  0x25   :  { %3854 = shalt.err (!%p3851_p1)
}
  0x26   :  { %60 = dma.hbm_to_vmem [thread:$0]  %s4255_s3, 64, %s58_s16, [#allocation9]  }
  0x27   :  { %s3855_s30 = scalar_lea.hbm %s4252_s0, 256 }
  0x28   :  { %p3856_p2 = scmp.ne.s32.totalorder %s4252_s0, %s3855_s30  ;;  %p3859_p3 = scmp.lt.u32.totalorder %s3855_s30, %s4252_s0 }
  0x2a   :  { %p3861_p4 = pnand %p3859_p3, %p3856_p2 }
  0x2c   :  { %3864 = shalt.err (!%p3861_p4)
}
  0x2d   :  { %s3865_s12 = scalar_lea.vmem %s26_s18, 256  ;;  %p3870_p6 = scmp.lt.s32.totalorder %s26_s18, %s26_s18 }
  0x2e   :  { %p3866_p5 = scmp.ne.s32.totalorder %s26_s18, %s3865_s12  ;;  %p3871_p7 = scmp.lt.s32.totalorder %s3865_s12, %s3865_s12 }
  0x30   :  { %p3872_p8 = por %p3871_p7, %p3870_p6 }
  0x32   :  { %p3873_p9 = pnand %p3872_p8, %p3866_p5 }
  0x34   :  { %3876 = shalt.err (!%p3873_p9)
}
  0x35   :  { %28 = dma.hbm_to_vmem [thread:$0]  %s4252_s0, 256, %s26_s18, [#allocation3]  }
  0x36   :  { %s4004_s14 = smov [#allocation7]   ;;  %s4005_s16 = smov [#allocation10]  }
  0x37   :  { %s47_s15 = sshll.u32 %s4004_s14, 4  ;;  %s66_s17 = sshll.u32 %s4005_s16, 4  ;;  %s48_s15 = int_to_ptr.vmem [resolvable:$true] %s47_s15  ;;  %s67_s17 = int_to_ptr.vmem [resolvable:$true] %s66_s17 }
  0x38   :  { %s3877_s21 = scalar_lea.hbm %s4254_s2, 192 }
  0x39   :  { %p3878_p10 = scmp.ne.s32.totalorder %s4254_s2, %s3877_s21  ;;  %p3881_p11 = scmp.lt.u32.totalorder %s3877_s21, %s4254_s2 }
  0x3b   :  { %p3883_p12 = pnand %p3881_p11, %p3878_p10 }
  0x3d   :  { %3886 = shalt.err (!%p3883_p12)
}
  0x3e   :  { %s3887_s0 = scalar_lea.vmem %s48_s15, 192  ;;  %p3892_p0 = scmp.lt.s32.totalorder %s48_s15, %s48_s15 }
  0x3f   :  { %p3888_p13 = scmp.ne.s32.totalorder %s48_s15, %s3887_s0  ;;  %p3893_p1 = scmp.lt.s32.totalorder %s3887_s0, %s3887_s0 }
  0x41   :  { %p3894_p2 = por %p3893_p1, %p3892_p0 }
  0x43   :  { %p3895_p3 = pnand %p3894_p2, %p3888_p13 }
  0x45   :  { %3898 = shalt.err (!%p3895_p3)
}
  0x46   :  { %50 = dma.hbm_to_vmem [thread:$0]  %s4254_s2, 192, %s48_s15, [#allocation6]  }
  0x47   :  { %s3899_s28 = scalar_lea.hbm %s4256_s4, 3072 }
  0x48   :  { %p3900_p4 = scmp.ne.s32.totalorder %s4256_s4, %s3899_s28  ;;  %p3903_p5 = scmp.lt.u32.totalorder %s3899_s28, %s4256_s4 }
  0x4a   :  { %p3905_p6 = pnand %p3903_p5, %p3900_p4 }
  0x4c   :  { %3908 = shalt.err (!%p3905_p6)
}
  0x4d   :  { %s3909_s10 = scalar_lea.vmem %s67_s17, 3072  ;;  %p3914_p8 = scmp.lt.s32.totalorder %s67_s17, %s67_s17 }
  0x4e   :  { %p3910_p7 = scmp.ne.s32.totalorder %s67_s17, %s3909_s10  ;;  %p3915_p9 = scmp.lt.s32.totalorder %s3909_s10, %s3909_s10 }
  0x50   :  { %p3916_p10 = por %p3915_p9, %p3914_p8 }
  0x52   :  { %p3917_p11 = pnand %p3916_p10, %p3910_p7 }
  0x54   :  { %3920 = shalt.err (!%p3917_p11)
}
  0x55   :  { %s4006_s2 = smov 512   ;;  %s4007_s11 = smov 32  }
  0x56   :  { %72 = dma.hbm_to_vmem [thread:$0]  %s4256_s4, 3072, %s67_s17, [#allocation9], %s4006_s2, %s4006_s2, %s4007_s11  }
  0x57   :  { %s4008_s13 = smov [#allocation11]   ;;  %s3921_s19 = scalar_lea.hbm %s4257_s5, 128 }
  0x58   :  { %s79_s14 = sshll.u32 %s4008_s13, 4  ;;  %p3922_p12 = scmp.ne.s32.totalorder %s4257_s5, %s3921_s19  ;;  %s80_s14 = int_to_ptr.vmem [resolvable:$true] %s79_s14 }
  0x59   :  { %p3925_p13 = scmp.lt.u32.totalorder %s3921_s19, %s4257_s5 }
  0x5b   :  { %p3927_p0 = pnand %p3925_p13, %p3922_p12 }
  0x5d   :  { %3930 = shalt.err (!%p3927_p0)
}
  0x5e   :  { %s3931_s24 = scalar_lea.vmem %s80_s14, 128  ;;  %p3936_p2 = scmp.lt.s32.totalorder %s80_s14, %s80_s14 }
  0x5f   :  { %p3932_p1 = scmp.ne.s32.totalorder %s80_s14, %s3931_s24  ;;  %p3937_p3 = scmp.lt.s32.totalorder %s3931_s24, %s3931_s24 }
  0x61   :  { %p3938_p4 = por %p3937_p3, %p3936_p2 }
  0x63   :  { %p3939_p5 = pnand %p3938_p4, %p3932_p1 }
  0x65   :  { %3942 = shalt.err (!%p3939_p5)
}
  0x66   :  { %82 = dma.hbm_to_vmem [thread:$0]  %s4257_s5, 128, %s80_s14, [#allocation12]  }
  0x67   :  { %3987 = dma.done.wait [#allocation3], 256  }
  0x68   :  { %3988 = vsyncadd [#allocation3], 4294967040 }
  0x69   :  { %3989 = dma.done.wait [#allocation6], 40128  }
  0x6a   :  { %3990 = vsyncadd [#allocation6], 4294927168 }
  0x6b   :  { %3991 = dma.done.wait [#allocation9], 3136  }
  0x6c   :  { %3992 = vsyncadd [#allocation9], 4294964160 }
  0x6d   :  { %3993 = dma.done.wait [#allocation12], 128  }
  0x6e   :  { %3994 = vsyncadd [#allocation12], 4294967168  ;;  %v3339_v0 = vld [vmem:[#allocation5 + $0x4] ss:$48 sps:$4 sm:$0xff]   ;;  %v3343_v2 = vld [vmem:[#allocation5] ss:$48 sps:$4 sm:$0xff]  }
  0x6f   :  { %v3341_v1 = vld [vmem:[#allocation5 + $0x604] ss:$48 sps:$4 sm:$0xff]   ;;  %1993 = vmatprep.subr.bf16.mxu0 %v3339_v0  ;;  %v3344_v3 = vld [vmem:[#allocation5 + $0x600] ss:$48 sps:$4 sm:$0xff]   ;;  %v103_v30 = vld [vmem:[#allocation2 + $0x8] sm:$0xff]  ;;  %vm1989_vm0 = vcmask 261120  }
  0x70   :  { %2034 = vmatprep.subr.bf16.mxu1 %v3341_v1  ;;  %v3345_v4 = vld [vmem:[#allocation5 + $0x64] ss:$48 sps:$4 sm:$0xff]   ;;  %1994 = vmatpush1.bf16.msra.mxu0 %v3343_v2  ;;  %v3349_v6 = vld [vmem:[#allocation5 + $0x60] ss:$48 sps:$4 sm:$0xff]   ;;  %v4124_v32 = vcombine.high %v103_v30, %v103_v30  ;;  %v3405_v43 = vld [vmem:[#allocation5 + $0xc] ss:$48 sps:$4 sm:$0xff]   ;;  %v4128_v44 = vcombine.low %v103_v30, %v103_v30 }
  0x71   :  { %2035 = vmatpush1.bf16.msra.mxu1 %v3344_v3  ;;  %v3347_v5 = vld [vmem:[#allocation5 + $0x664] ss:$48 sps:$4 sm:$0xff]   ;;  %1995 = vmatprep.subr.bf16.mxu0 %v3345_v4  ;;  %v3350_v7 = vld [vmem:[#allocation5 + $0x660] ss:$48 sps:$4 sm:$0xff]   ;;  %v3403_v45 = vld [vmem:[#allocation5 + $0x8] ss:$48 sps:$4 sm:$0xff]  }
  0x72   :  { %2036 = vmatprep.subr.bf16.mxu1 %v3347_v5  ;;  %v3351_v8 = vld [vmem:[#allocation5 + $0xc4] ss:$48 sps:$4 sm:$0xff]   ;;  %v3355_v10 = vld [vmem:[#allocation5 + $0xc0] ss:$48 sps:$4 sm:$0xff]   ;;  %3292 = vmatprep.mubr.msk.bf16.mxu1 %vm1989_vm0, %v4124_v32  ;;  %v3411_v48 = vld [vmem:[#allocation5 + $0x6c] ss:$48 sps:$4 sm:$0xff]  }
  0x73   :  { %v3353_v9 = vld [vmem:[#allocation5 + $0x6c4] ss:$48 sps:$4 sm:$0xff]   ;;  %v3356_v11 = vld [vmem:[#allocation5 + $0x6c0] ss:$48 sps:$4 sm:$0xff]   ;;  %v3409_v50 = vld [vmem:[#allocation5 + $0x68] ss:$48 sps:$4 sm:$0xff]  }
  0x74   :  { %1996 = vmatpush1.bf16.msra.mxu0 %v3349_v6  ;;  %v3357_v12 = vld [vmem:[#allocation5 + $0x124] ss:$48 sps:$4 sm:$0xff]   ;;  %v3361_v14 = vld [vmem:[#allocation5 + $0x120] ss:$48 sps:$4 sm:$0xff]   ;;  %v3417_v54 = vld [vmem:[#allocation5 + $0xcc] ss:$48 sps:$4 sm:$0xff]  }
  0x75   :  { %2037 = vmatpush1.bf16.msra.mxu1 %v3350_v7  ;;  %1997 = vmatprep.subr.bf16.mxu0 %v3351_v8  ;;  %v3359_v13 = vld [vmem:[#allocation5 + $0x724] ss:$48 sps:$4 sm:$0xff]   ;;  %v3362_v15 = vld [vmem:[#allocation5 + $0x720] ss:$48 sps:$4 sm:$0xff]   ;;  %v3415_v55 = vld [vmem:[#allocation5 + $0xc8] ss:$48 sps:$4 sm:$0xff]  }
  0x76   :  { %2038 = vmatprep.subr.bf16.mxu1 %v3353_v9  ;;  %v3363_v16 = vld [vmem:[#allocation5 + $0x184] ss:$48 sps:$4 sm:$0xff]   ;;  %v3367_v18 = vld [vmem:[#allocation5 + $0x180] ss:$48 sps:$4 sm:$0xff]   ;;  %v3423_v58 = vld [vmem:[#allocation5 + $0x12c] ss:$48 sps:$4 sm:$0xff]  }
  0x77   :  { %v3365_v17 = vld [vmem:[#allocation5 + $0x784] ss:$48 sps:$4 sm:$0xff]   ;;  %v3368_v19 = vld [vmem:[#allocation5 + $0x780] ss:$48 sps:$4 sm:$0xff]   ;;  %v3421_v59 = vld [vmem:[#allocation5 + $0x128] ss:$48 sps:$4 sm:$0xff]  }
  0x78   :  { %1998 = vmatpush1.bf16.msra.mxu0 %v3355_v10  ;;  %v3369_v20 = vld [vmem:[#allocation5 + $0x1e4] ss:$48 sps:$4 sm:$0xff]   ;;  %v3373_v22 = vld [vmem:[#allocation5 + $0x1e0] ss:$48 sps:$4 sm:$0xff]   ;;  %v3429_v62 = vld [vmem:[#allocation5 + $0x18c] ss:$48 sps:$4 sm:$0xff]  }
  0x79   :  { %2039 = vmatpush1.bf16.msra.mxu1 %v3356_v11  ;;  %1999 = vmatprep.subr.bf16.mxu0 %v3357_v12  ;;  %v3371_v21 = vld [vmem:[#allocation5 + $0x7e4] ss:$48 sps:$4 sm:$0xff]   ;;  %v3374_v23 = vld [vmem:[#allocation5 + $0x7e0] ss:$48 sps:$4 sm:$0xff]   ;;  %v3427_v63 = vld [vmem:[#allocation5 + $0x188] ss:$48 sps:$4 sm:$0xff]  }
  0x7a   :  { %2040 = vmatprep.subr.bf16.mxu1 %v3359_v13  ;;  %v3375_v24 = vld [vmem:[#allocation5 + $0x244] ss:$48 sps:$4 sm:$0xff]   ;;  %v3379_v26 = vld [vmem:[#allocation5 + $0x240] ss:$48 sps:$4 sm:$0xff]   ;;  %v3435_v2 = vld [vmem:[#allocation5 + $0x1ec] ss:$48 sps:$4 sm:$0xff]  }
  0x7b   :  { %v3377_v25 = vld [vmem:[#allocation5 + $0x844] ss:$48 sps:$4 sm:$0xff]   ;;  %v3380_v27 = vld [vmem:[#allocation5 + $0x840] ss:$48 sps:$4 sm:$0xff]   ;;  %v3433_v3 = vld [vmem:[#allocation5 + $0x1e8] ss:$48 sps:$4 sm:$0xff]  }
  0x7c   :  { %2000 = vmatpush1.bf16.msra.mxu0 %v3361_v14  ;;  %v3381_v28 = vld [vmem:[#allocation5 + $0x2a4] ss:$48 sps:$4 sm:$0xff]   ;;  %v3385_v31 = vld [vmem:[#allocation5 + $0x2a0] ss:$48 sps:$4 sm:$0xff]   ;;  %v3441_v5 = vld [vmem:[#allocation5 + $0x24c] ss:$48 sps:$4 sm:$0xff]  }
  0x7d   :  { %2041 = vmatpush1.bf16.msra.mxu1 %v3362_v15  ;;  %2001 = vmatprep.subr.bf16.mxu0 %v3363_v16  ;;  %v3383_v29 = vld [vmem:[#allocation5 + $0x8a4] ss:$48 sps:$4 sm:$0xff]   ;;  %v3386_v33 = vld [vmem:[#allocation5 + $0x8a0] ss:$48 sps:$4 sm:$0xff]   ;;  %v3444_v6 = vld [vmem:[#allocation5 + $0x60c] ss:$48 sps:$4 sm:$0xff]  }
  0x7e   :  { %2042 = vmatprep.subr.bf16.mxu1 %v3365_v17  ;;  %v3387_v34 = vld [vmem:[#allocation5 + $0x304] ss:$48 sps:$4 sm:$0xff]   ;;  %v3391_v36 = vld [vmem:[#allocation5 + $0x300] ss:$48 sps:$4 sm:$0xff]   ;;  %v3439_v8 = vld [vmem:[#allocation5 + $0x248] ss:$48 sps:$4 sm:$0xff]  }
  0x7f   :  { %v3389_v35 = vld [vmem:[#allocation5 + $0x904] ss:$48 sps:$4 sm:$0xff]   ;;  %v3392_v37 = vld [vmem:[#allocation5 + $0x900] ss:$48 sps:$4 sm:$0xff]   ;;  %v3442_v9 = vld [vmem:[#allocation5 + $0x608] ss:$48 sps:$4 sm:$0xff]  }
  0x80   :  { %2002 = vmatpush1.bf16.msra.mxu0 %v3367_v18  ;;  %v3393_v38 = vld [vmem:[#allocation5 + $0x364] ss:$48 sps:$4 sm:$0xff]   ;;  %v3397_v40 = vld [vmem:[#allocation5 + $0x360] ss:$48 sps:$4 sm:$0xff]   ;;  %v3447_v10 = vld [vmem:[#allocation5 + $0x2ac] ss:$48 sps:$4 sm:$0xff]  }
  0x81   :  { %2043 = vmatpush1.bf16.msra.mxu1 %v3368_v19  ;;  %2003 = vmatprep.subr.bf16.mxu0 %v3369_v20  ;;  %v3395_v39 = vld [vmem:[#allocation5 + $0x964] ss:$48 sps:$4 sm:$0xff]   ;;  %v3398_v41 = vld [vmem:[#allocation5 + $0x960] ss:$48 sps:$4 sm:$0xff]   ;;  %v3450_v11 = vld [vmem:[#allocation5 + $0x66c] ss:$48 sps:$4 sm:$0xff]  }
  0x82   :  { %2044 = vmatprep.subr.bf16.mxu1 %v3371_v21  ;;  %v3400_v42 = vld [vmem:[#allocation5 + $0x3c4] ss:$48 sps:$4 sm:$0xff]   ;;  %v3406_v46 = vld [vmem:[#allocation5 + $0x3c0] ss:$48 sps:$4 sm:$0xff]   ;;  %v3445_v12 = vld [vmem:[#allocation5 + $0x2a8] ss:$48 sps:$4 sm:$0xff]  }
  0x83   :  { %v3407_v47 = vld [vmem:[#allocation5 + $0x424] ss:$48 sps:$4 sm:$0xff]   ;;  %v3412_v51 = vld [vmem:[#allocation5 + $0x420] ss:$48 sps:$4 sm:$0xff]   ;;  %v3448_v13 = vld [vmem:[#allocation5 + $0x668] ss:$48 sps:$4 sm:$0xff]  }
  0x84   :  { %2004 = vmatpush1.bf16.msra.mxu0 %v3373_v22  ;;  %v102_v49 = vld [vmem:[#allocation2] sm:$0xff]  ;;  %v3453_v14 = vld [vmem:[#allocation5 + $0x30c] ss:$48 sps:$4 sm:$0xff]   ;;  %v3451_v16 = vld [vmem:[#allocation5 + $0x308] ss:$48 sps:$4 sm:$0xff]   ;;  %vm2718_vm1 = vcmask 392192  }
  0x85   :  { %2045 = vmatpush1.bf16.msra.mxu1 %v3374_v23  ;;  %2005 = vmatprep.subr.bf16.mxu0 %v3375_v24  ;;  %v4131_v52 = vcombine.high %v102_v49, %v102_v49  ;;  %v3413_v53 = vld [vmem:[#allocation5 + $0x484] ss:$48 sps:$4 sm:$0xff]   ;;  %v3418_v56 = vld [vmem:[#allocation5 + $0x480] ss:$48 sps:$4 sm:$0xff]   ;;  %v4135_v7 = vcombine.low %v102_v49, %v102_v49  ;;  %v3456_v15 = vld [vmem:[#allocation5 + $0x6cc] ss:$48 sps:$4 sm:$0xff]  }
  0x86   :  { %2046 = vmatprep.subr.bf16.mxu1 %v3377_v25  ;;  %v3419_v57 = vld [vmem:[#allocation5 + $0x4e4] ss:$48 sps:$4 sm:$0xff]   ;;  %v3424_v60 = vld [vmem:[#allocation5 + $0x4e0] ss:$48 sps:$4 sm:$0xff]   ;;  %v3454_v17 = vld [vmem:[#allocation5 + $0x6c8] ss:$48 sps:$4 sm:$0xff]  }
  0x87   :  { %2025 = vmatprep.mubr.bf16.mxu0 %v4131_v52  ;;  %v3425_v61 = vld [vmem:[#allocation5 + $0x544] ss:$48 sps:$4 sm:$0xff]   ;;  %v3430_v0 = vld [vmem:[#allocation5 + $0x540] ss:$48 sps:$4 sm:$0xff]   ;;  %v3459_v18 = vld [vmem:[#allocation5 + $0x36c] ss:$48 sps:$4 sm:$0xff]  }
  0x88   :  { %2006 = vmatpush1.bf16.msra.mxu0 %v3379_v26  ;;  %v3431_v1 = vld [vmem:[#allocation5 + $0x5a4] ss:$48 sps:$4 sm:$0xff]   ;;  %v3436_v4 = vld [vmem:[#allocation5 + $0x5a0] ss:$48 sps:$4 sm:$0xff]   ;;  %v3462_v19 = vld [vmem:[#allocation5 + $0x72c] ss:$48 sps:$4 sm:$0xff]  }
  0x89   :  { %2047 = vmatpush1.bf16.msra.mxu1 %v3380_v27  ;;  %2007 = vmatprep.subr.bf16.mxu0 %v3381_v28  ;;  %v3457_v20 = vld [vmem:[#allocation5 + $0x368] ss:$48 sps:$4 sm:$0xff]   ;;  %v3465_v22 = vld [vmem:[#allocation5 + $0x3cc] ss:$48 sps:$4 sm:$0xff]   ;;  %v3504_v49 = vld [vmem:[#allocation5 + $0x614] ss:$48 sps:$4 sm:$0xff]  }
  0x8a   :  { %2048 = vmatprep.subr.bf16.mxu1 %v3383_v29  ;;  %v3460_v21 = vld [vmem:[#allocation5 + $0x728] ss:$48 sps:$4 sm:$0xff]   ;;  %v3468_v23 = vld [vmem:[#allocation5 + $0x78c] ss:$48 sps:$4 sm:$0xff]   ;;  %s4010_s5 = smov [#allocation13]  }
  0x8b   :  { %v3463_v24 = vld [vmem:[#allocation5 + $0x3c8] ss:$48 sps:$4 sm:$0xff]   ;;  %v3471_v26 = vld [vmem:[#allocation5 + $0x42c] ss:$48 sps:$4 sm:$0xff]   ;;  %s2950_s26 = sshll.u32 %s4010_s5, 4  ;;  %s2951_s26 = int_to_ptr.vmem [resolvable:$true] %s2950_s26 }
  0x8c   :  { %2008 = vmatpush1.bf16.msra.mxu0 %v3385_v31  ;;  %v3466_v25 = vld [vmem:[#allocation5 + $0x788] ss:$48 sps:$4 sm:$0xff]   ;;  %v3474_v27 = vld [vmem:[#allocation5 + $0x7ec] ss:$48 sps:$4 sm:$0xff]   ;;  %s3943_s0 = scalar_lea.vmem %s2951_s26, 1536  ;;  %p3948_p7 = scmp.lt.s32.totalorder %s2951_s26, %s2951_s26 }
  0x8d   :  { %2049 = vmatpush1.bf16.msra.mxu1 %v3386_v33  ;;  %2009 = vmatprep.subr.bf16.mxu0 %v3387_v34  ;;  %v3469_v28 = vld [vmem:[#allocation5 + $0x428] ss:$48 sps:$4 sm:$0xff]   ;;  %v3477_v30 = vld [vmem:[#allocation5 + $0x48c] ss:$48 sps:$4 sm:$0xff]   ;;  %p3944_p6 = scmp.ne.s32.totalorder %s2951_s26, %s3943_s0  ;;  %p3949_p8 = scmp.lt.s32.totalorder %s3943_s0, %s3943_s0 }
  0x8e   :  { %2050 = vmatprep.subr.bf16.mxu1 %v3389_v35  ;;  %v3472_v29 = vld [vmem:[#allocation5 + $0x7e8] ss:$48 sps:$4 sm:$0xff]   ;;  %v3480_v31 = vld [vmem:[#allocation5 + $0x84c] ss:$48 sps:$4 sm:$0xff]  }
  0x8f   :  { %v3475_v33 = vld [vmem:[#allocation5 + $0x488] ss:$48 sps:$4 sm:$0xff]   ;;  %v3483_v35 = vld [vmem:[#allocation5 + $0x4ec] ss:$48 sps:$4 sm:$0xff]   ;;  %p3950_p9 = por %p3949_p8, %p3948_p7 }
  0x90   :  { %2010 = vmatpush1.bf16.msra.mxu0 %v3391_v36  ;;  %v3478_v34 = vld [vmem:[#allocation5 + $0x848] ss:$48 sps:$4 sm:$0xff]   ;;  %v3486_v36 = vld [vmem:[#allocation5 + $0x8ac] ss:$48 sps:$4 sm:$0xff]  }
  0x91   :  { %2051 = vmatpush1.bf16.msra.mxu1 %v3392_v37  ;;  %2011 = vmatprep.subr.bf16.mxu0 %v3393_v38  ;;  %v3481_v37 = vld [vmem:[#allocation5 + $0x4e8] ss:$48 sps:$4 sm:$0xff]   ;;  %p3951_p10 = pnand %p3950_p9, %p3944_p6 }
  0x92   :  { %2052 = vmatprep.subr.bf16.mxu1 %v3395_v39  ;;  %v3484_v38 = vld [vmem:[#allocation5 + $0x8a8] ss:$48 sps:$4 sm:$0xff]   ;;  %v3489_v39 = vld [vmem:[#allocation5 + $0x54c] ss:$48 sps:$4 sm:$0xff]  }
  0x94   :  { %2012 = vmatpush1.bf16.msra.mxu0 %v3397_v40  ;;  %v3492_v40 = vld [vmem:[#allocation5 + $0x90c] ss:$48 sps:$4 sm:$0xff]  }
  0x95   :  { %2053 = vmatpush1.bf16.msra.mxu1 %v3398_v41  ;;  %2013 = vmatprep.subr.bf16.mxu0 %v3400_v42  ;;  %v3487_v41 = vld [vmem:[#allocation5 + $0x548] ss:$48 sps:$4 sm:$0xff]  }
  0x96   :  { %2075 = vmatprep.subr.bf16.mxu1 %v3405_v43  ;;  %v3490_v42 = vld [vmem:[#allocation5 + $0x908] ss:$48 sps:$4 sm:$0xff]   ;;  %v3495_v43 = vld [vmem:[#allocation5 + $0x5ac] ss:$48 sps:$4 sm:$0xff]  }
  0x98   :  { %2067 = vmatmul.mubr.bf16.vlgmr.msra.gmra.mrb[0].mxu1 %v4128_v44  ;;  %2014 = vmatpush1.bf16.msra.mxu0 %v3406_v46  ;;  %v3493_v46 = vld [vmem:[#allocation5 + $0x5a8] ss:$48 sps:$4 sm:$0xff]  }
  0x99   :  { %2076 = vmatpush1.bf16.msra.mxu1 %v3403_v45  ;;  %2015 = vmatprep.subr.bf16.mxu0 %v3407_v47  ;;  %v3498_v45 = vld [vmem:[#allocation5 + $0x96c] ss:$48 sps:$4 sm:$0xff]   ;;  %v3496_v47 = vld [vmem:[#allocation5 + $0x968] ss:$48 sps:$4 sm:$0xff]  }
  0x9a   :  { %2077 = vmatprep.subr.bf16.mxu1 %v3411_v48  ;;  %2107 = vmatprep.mubr.bf16.mxu1 %v4131_v52  ;;  %v3501_v48 = vld [vmem:[#allocation5 + $0x14] ss:$48 sps:$4 sm:$0xff]  }
  0x9c   :  { %2016 = vmatpush1.bf16.msra.mxu0 %v3412_v51  ;;  %v3502_v51 = vld [vmem:[#allocation5 + $0x610] ss:$48 sps:$4 sm:$0xff]  }
  0x9d   :  { %2078 = vmatpush1.bf16.msra.mxu1 %v3409_v50  ;;  %2017 = vmatprep.subr.bf16.mxu0 %v3413_v53  ;;  %v3499_v50 = vld [vmem:[#allocation5 + $0x10] ss:$48 sps:$4 sm:$0xff]   ;;  %v3507_v53 = vld [vmem:[#allocation5 + $0x74] ss:$48 sps:$4 sm:$0xff]  }
  0x9e   :  { %2079 = vmatprep.subr.bf16.mxu1 %v3417_v54  ;;  %v3510_v54 = vld [vmem:[#allocation5 + $0x674] ss:$48 sps:$4 sm:$0xff]  }
  0xa0   :  { %2018 = vmatpush1.bf16.msra.mxu0 %v3418_v56  ;;  %v3508_v56 = vld [vmem:[#allocation5 + $0x670] ss:$48 sps:$4 sm:$0xff]  }
  0xa1   :  { %2080 = vmatpush1.bf16.msra.mxu1 %v3415_v55  ;;  %2019 = vmatprep.subr.bf16.mxu0 %v3419_v57  ;;  %v3505_v55 = vld [vmem:[#allocation5 + $0x70] ss:$48 sps:$4 sm:$0xff]   ;;  %v3513_v57 = vld [vmem:[#allocation5 + $0xd4] ss:$48 sps:$4 sm:$0xff]  }
  0xa2   :  { %2081 = vmatprep.subr.bf16.mxu1 %v3423_v58  ;;  %v3516_v58 = vld [vmem:[#allocation5 + $0x6d4] ss:$48 sps:$4 sm:$0xff]  }
  0xa4   :  { %2020 = vmatpush1.bf16.msra.mxu0 %v3424_v60  ;;  %v3514_v60 = vld [vmem:[#allocation5 + $0x6d0] ss:$48 sps:$4 sm:$0xff]  }
  0xa5   :  { %2082 = vmatpush1.bf16.msra.mxu1 %v3421_v59  ;;  %2021 = vmatprep.subr.bf16.mxu0 %v3425_v61  ;;  %v3511_v59 = vld [vmem:[#allocation5 + $0xd0] ss:$48 sps:$4 sm:$0xff]   ;;  %v3519_v61 = vld [vmem:[#allocation5 + $0x134] ss:$48 sps:$4 sm:$0xff]  }
  0xa6   :  { %2083 = vmatprep.subr.bf16.mxu1 %v3429_v62  ;;  %v3522_v62 = vld [vmem:[#allocation5 + $0x734] ss:$48 sps:$4 sm:$0xff]  }
  0xa8   :  { %2022 = vmatpush1.bf16.msra.mxu0 %v3430_v0  ;;  %v3520_v0 = vld [vmem:[#allocation5 + $0x730] ss:$48 sps:$4 sm:$0xff]  }
  0xa9   :  { %2084 = vmatpush1.bf16.msra.mxu1 %v3427_v63  ;;  %2023 = vmatprep.subr.bf16.mxu0 %v3431_v1  ;;  %v3517_v63 = vld [vmem:[#allocation5 + $0x130] ss:$48 sps:$4 sm:$0xff]   ;;  %v3525_v1 = vld [vmem:[#allocation5 + $0x194] ss:$48 sps:$4 sm:$0xff]  }
  0xaa   :  { %2085 = vmatprep.subr.bf16.mxu1 %v3435_v2  ;;  %v3528_v2 = vld [vmem:[#allocation5 + $0x794] ss:$48 sps:$4 sm:$0xff]  }
  0xac   :  { %2024 = vmatpush1.bf16.msra.mxu0 %v3436_v4  ;;  %v3526_v4 = vld [vmem:[#allocation5 + $0x790] ss:$48 sps:$4 sm:$0xff]  }
  0xad   :  { %2086 = vmatpush1.bf16.msra.mxu1 %v3433_v3  ;;  %2116 = vmatprep.subr.bf16.mxu0 %v3444_v6  ;;  %v3523_v3 = vld [vmem:[#allocation5 + $0x190] ss:$48 sps:$4 sm:$0xff]   ;;  %v3534_v6 = vld [vmem:[#allocation5 + $0x7f4] ss:$48 sps:$4 sm:$0xff]  }
  0xae   :  { %2087 = vmatprep.subr.bf16.mxu1 %v3441_v5  ;;  %v3531_v5 = vld [vmem:[#allocation5 + $0x1f4] ss:$48 sps:$4 sm:$0xff]  }
  0xaf   :  { %2026 = vmatmul.mubr.bf16.vlgmr.msra.gmra.mrb[0].mxu0 %v4135_v7 }
  0xb0   :  { %2117 = vmatpush1.bf16.msra.mxu0 %v3442_v9  ;;  %3293 = vmatprep.mubr.msk.bf16.mxu0 %vm1989_vm0, %v4124_v32  ;;  %v3532_v9 = vld [vmem:[#allocation5 + $0x7f0] ss:$48 sps:$4 sm:$0xff]  }
  0xb1   :  { %2088 = vmatpush1.bf16.msra.mxu1 %v3439_v8  ;;  %2118 = vmatprep.subr.bf16.mxu0 %v3450_v11  ;;  %v3529_v8 = vld [vmem:[#allocation5 + $0x1f0] ss:$48 sps:$4 sm:$0xff]   ;;  %v3540_v11 = vld [vmem:[#allocation5 + $0x854] ss:$48 sps:$4 sm:$0xff]  }
  0xb2   :  { %2089 = vmatprep.subr.bf16.mxu1 %v3447_v10  ;;  %v3537_v10 = vld [vmem:[#allocation5 + $0x254] ss:$48 sps:$4 sm:$0xff]  }
  0xb4   :  { %2119 = vmatpush1.bf16.msra.mxu0 %v3448_v13  ;;  %v3538_v13 = vld [vmem:[#allocation5 + $0x850] ss:$48 sps:$4 sm:$0xff]  }
  0xb5   :  { %2090 = vmatpush1.bf16.msra.mxu1 %v3445_v12  ;;  %2120 = vmatprep.subr.bf16.mxu0 %v3456_v15  ;;  %v3535_v12 = vld [vmem:[#allocation5 + $0x250] ss:$48 sps:$4 sm:$0xff]   ;;  %v3546_v15 = vld [vmem:[#allocation5 + $0x8b4] ss:$48 sps:$4 sm:$0xff]  }
  0xb6   :  { %2091 = vmatprep.subr.bf16.mxu1 %v3453_v14  ;;  %v3543_v14 = vld [vmem:[#allocation5 + $0x2b4] ss:$48 sps:$4 sm:$0xff]  }
  0xb8   :  { %2121 = vmatpush1.bf16.msra.mxu0 %v3454_v17  ;;  %v3544_v17 = vld [vmem:[#allocation5 + $0x8b0] ss:$48 sps:$4 sm:$0xff]  }
  0xb9   :  { %2092 = vmatpush1.bf16.msra.mxu1 %v3451_v16  ;;  %2122 = vmatprep.subr.bf16.mxu0 %v3462_v19  ;;  %v3541_v16 = vld [vmem:[#allocation5 + $0x2b0] ss:$48 sps:$4 sm:$0xff]   ;;  %v3552_v19 = vld [vmem:[#allocation5 + $0x914] ss:$48 sps:$4 sm:$0xff]  }
  0xba   :  { %2093 = vmatprep.subr.bf16.mxu1 %v3459_v18  ;;  %v3549_v18 = vld [vmem:[#allocation5 + $0x314] ss:$48 sps:$4 sm:$0xff]  }
  0xbc   :  { %2123 = vmatpush1.bf16.msra.mxu0 %v3460_v21  ;;  %v3550_v21 = vld [vmem:[#allocation5 + $0x910] ss:$48 sps:$4 sm:$0xff]  }
  0xbd   :  { %2094 = vmatpush1.bf16.msra.mxu1 %v3457_v20  ;;  %2124 = vmatprep.subr.bf16.mxu0 %v3468_v23  ;;  %v3547_v20 = vld [vmem:[#allocation5 + $0x310] ss:$48 sps:$4 sm:$0xff]   ;;  %v3558_v23 = vld [vmem:[#allocation5 + $0x974] ss:$48 sps:$4 sm:$0xff]  }
  0xbe   :  { %2095 = vmatprep.subr.bf16.mxu1 %v3465_v22  ;;  %v3555_v22 = vld [vmem:[#allocation5 + $0x374] ss:$48 sps:$4 sm:$0xff]  }
  0xc0   :  { %2125 = vmatpush1.bf16.msra.mxu0 %v3466_v25  ;;  %v3556_v25 = vld [vmem:[#allocation5 + $0x970] ss:$48 sps:$4 sm:$0xff]  }
  0xc1   :  { %2096 = vmatpush1.bf16.msra.mxu1 %v3463_v24  ;;  %2126 = vmatprep.subr.bf16.mxu0 %v3474_v27  ;;  %v3553_v24 = vld [vmem:[#allocation5 + $0x370] ss:$48 sps:$4 sm:$0xff]   ;;  %v3564_v27 = vld [vmem:[#allocation5 + $0x1c] ss:$48 sps:$4 sm:$0xff]  }
  0xc2   :  { %2097 = vmatprep.subr.bf16.mxu1 %v3471_v26  ;;  %v3561_v26 = vld [vmem:[#allocation5 + $0x3d4] ss:$48 sps:$4 sm:$0xff]  }
  0xc4   :  { %2127 = vmatpush1.bf16.msra.mxu0 %v3472_v29  ;;  %v3562_v29 = vld [vmem:[#allocation5 + $0x18] ss:$48 sps:$4 sm:$0xff]  }
  0xc5   :  { %2098 = vmatpush1.bf16.msra.mxu1 %v3469_v28  ;;  %2128 = vmatprep.subr.bf16.mxu0 %v3480_v31  ;;  %v3559_v28 = vld [vmem:[#allocation5 + $0x3d0] ss:$48 sps:$4 sm:$0xff]   ;;  %v3570_v31 = vld [vmem:[#allocation5 + $0x7c] ss:$48 sps:$4 sm:$0xff]  }
  0xc6   :  { %2099 = vmatprep.subr.bf16.mxu1 %v3477_v30  ;;  %v3567_v30 = vld [vmem:[#allocation5 + $0x434] ss:$48 sps:$4 sm:$0xff]  }
  0xc8   :  { %2129 = vmatpush1.bf16.msra.mxu0 %v3478_v34  ;;  %v3568_v34 = vld [vmem:[#allocation5 + $0x78] ss:$48 sps:$4 sm:$0xff]  }
  0xc9   :  { %2100 = vmatpush1.bf16.msra.mxu1 %v3475_v33  ;;  %2130 = vmatprep.subr.bf16.mxu0 %v3486_v36  ;;  %v3565_v33 = vld [vmem:[#allocation5 + $0x430] ss:$48 sps:$4 sm:$0xff]   ;;  %v3576_v36 = vld [vmem:[#allocation5 + $0xdc] ss:$48 sps:$4 sm:$0xff]  }
  0xca   :  { %2101 = vmatprep.subr.bf16.mxu1 %v3483_v35  ;;  %v3573_v35 = vld [vmem:[#allocation5 + $0x494] ss:$48 sps:$4 sm:$0xff]  }
  0xcc   :  { %2131 = vmatpush1.bf16.msra.mxu0 %v3484_v38  ;;  %v3574_v38 = vld [vmem:[#allocation5 + $0xd8] ss:$48 sps:$4 sm:$0xff]  }
  0xcd   :  { %2102 = vmatpush1.bf16.msra.mxu1 %v3481_v37  ;;  %2132 = vmatprep.subr.bf16.mxu0 %v3492_v40  ;;  %v3571_v37 = vld [vmem:[#allocation5 + $0x490] ss:$48 sps:$4 sm:$0xff]   ;;  %v3582_v40 = vld [vmem:[#allocation5 + $0x13c] ss:$48 sps:$4 sm:$0xff]  }
  0xce   :  { %2103 = vmatprep.subr.bf16.mxu1 %v3489_v39  ;;  %v3579_v39 = vld [vmem:[#allocation5 + $0x4f4] ss:$48 sps:$4 sm:$0xff]  }
  0xd0   :  { %2133 = vmatpush1.bf16.msra.mxu0 %v3490_v42  ;;  %v3580_v42 = vld [vmem:[#allocation5 + $0x138] ss:$48 sps:$4 sm:$0xff]  }
  0xd1   :  { %2104 = vmatpush1.bf16.msra.mxu1 %v3487_v41  ;;  %2134 = vmatprep.subr.bf16.mxu0 %v3498_v45  ;;  %v3577_v41 = vld [vmem:[#allocation5 + $0x4f0] ss:$48 sps:$4 sm:$0xff]   ;;  %v3588_v45 = vld [vmem:[#allocation5 + $0x19c] ss:$48 sps:$4 sm:$0xff]  }
  0xd2   :  { %2105 = vmatprep.subr.bf16.mxu1 %v3495_v43  ;;  %v3585_v43 = vld [vmem:[#allocation5 + $0x554] ss:$48 sps:$4 sm:$0xff]  }
  0xd4   :  { %2135 = vmatpush1.bf16.msra.mxu0 %v3496_v47  ;;  %v3586_v47 = vld [vmem:[#allocation5 + $0x198] ss:$48 sps:$4 sm:$0xff]  }
  0xd5   :  { %2106 = vmatpush1.bf16.msra.mxu1 %v3493_v46  ;;  %2157 = vmatprep.subr.bf16.mxu0 %v3501_v48  ;;  %v3583_v46 = vld [vmem:[#allocation5 + $0x550] ss:$48 sps:$4 sm:$0xff]   ;;  %v3591_v48 = vld [vmem:[#allocation5 + $0x5b4] ss:$48 sps:$4 sm:$0xff]  }
  0xd6   :  { %2198 = vmatprep.subr.bf16.mxu1 %v3504_v49  ;;  %v3594_v49 = vld [vmem:[#allocation5 + $0x1fc] ss:$48 sps:$4 sm:$0xff]  }
  0xd7   :  { %2149 = vmatmul.mubr.bf16.vlgmr.msra.gmra.mrb[4].mxu0 %v4128_v44 }
  0xd8   :  { %2108 = vmatmul.mubr.bf16.vlgmr.msra.gmra.mrb[4].mxu1 %v4135_v7  ;;  %2158 = vmatpush1.bf16.msra.mxu0 %v3499_v50  ;;  %v3589_v50 = vld [vmem:[#allocation5 + $0x5b0] ss:$48 sps:$4 sm:$0xff]  }
  0xd9   :  { %2199 = vmatpush1.bf16.msra.mxu1 %v3502_v51  ;;  %2159 = vmatprep.subr.bf16.mxu0 %v3507_v53  ;;  %v3592_v51 = vld [vmem:[#allocation5 + $0x1f8] ss:$48 sps:$4 sm:$0xff]   ;;  %v3597_v53 = vld [vmem:[#allocation5 + $0x25c] ss:$48 sps:$4 sm:$0xff]  }
  0xda   :  { %2200 = vmatprep.subr.bf16.mxu1 %v3510_v54  ;;  %3294 = vmatprep.mubr.msk.bf16.mxu1 %vm1989_vm0, %v4124_v32  ;;  %v3600_v54 = vld [vmem:[#allocation5 + $0x61c] ss:$48 sps:$4 sm:$0xff]  }
  0xdb   :  { %2189 = vmatprep.mubr.bf16.mxu0 %v4131_v52 }
  0xdc   :  { %2160 = vmatpush1.bf16.msra.mxu0 %v3505_v55  ;;  %v3595_v55 = vld [vmem:[#allocation5 + $0x258] ss:$48 sps:$4 sm:$0xff]  }
  0xdd   :  { %2201 = vmatpush1.bf16.msra.mxu1 %v3508_v56  ;;  %2161 = vmatprep.subr.bf16.mxu0 %v3513_v57  ;;  %v3598_v56 = vld [vmem:[#allocation5 + $0x618] ss:$48 sps:$4 sm:$0xff]   ;;  %v3603_v57 = vld [vmem:[#allocation5 + $0x2bc] ss:$48 sps:$4 sm:$0xff]  }
  0xde   :  { %2202 = vmatprep.subr.bf16.mxu1 %v3516_v58  ;;  %v3606_v58 = vld [vmem:[#allocation5 + $0x67c] ss:$48 sps:$4 sm:$0xff]  }
  0xe0   :  { %2162 = vmatpush1.bf16.msra.mxu0 %v3511_v59  ;;  %v3601_v59 = vld [vmem:[#allocation5 + $0x2b8] ss:$48 sps:$4 sm:$0xff]  }
  0xe1   :  { %2203 = vmatpush1.bf16.msra.mxu1 %v3514_v60  ;;  %2163 = vmatprep.subr.bf16.mxu0 %v3519_v61  ;;  %v3604_v60 = vld [vmem:[#allocation5 + $0x678] ss:$48 sps:$4 sm:$0xff]   ;;  %v3609_v61 = vld [vmem:[#allocation5 + $0x31c] ss:$48 sps:$4 sm:$0xff]  }
  0xe2   :  { %2204 = vmatprep.subr.bf16.mxu1 %v3522_v62  ;;  %v3612_v62 = vld [vmem:[#allocation5 + $0x6dc] ss:$48 sps:$4 sm:$0xff]  }
  0xe4   :  { %2164 = vmatpush1.bf16.msra.mxu0 %v3517_v63  ;;  %v3607_v63 = vld [vmem:[#allocation5 + $0x318] ss:$48 sps:$4 sm:$0xff]  }
  0xe5   :  { %2205 = vmatpush1.bf16.msra.mxu1 %v3520_v0  ;;  %2165 = vmatprep.subr.bf16.mxu0 %v3525_v1  ;;  %v3610_v0 = vld [vmem:[#allocation5 + $0x6d8] ss:$48 sps:$4 sm:$0xff]   ;;  %v3615_v1 = vld [vmem:[#allocation5 + $0x37c] ss:$48 sps:$4 sm:$0xff]  }
  0xe6   :  { %2206 = vmatprep.subr.bf16.mxu1 %v3528_v2  ;;  %v3618_v2 = vld [vmem:[#allocation5 + $0x73c] ss:$48 sps:$4 sm:$0xff]  }
  0xe8   :  { %2166 = vmatpush1.bf16.msra.mxu0 %v3523_v3  ;;  %v3613_v3 = vld [vmem:[#allocation5 + $0x378] ss:$48 sps:$4 sm:$0xff]  }
  0xe9   :  { %2207 = vmatpush1.bf16.msra.mxu1 %v3526_v4  ;;  %2167 = vmatprep.subr.bf16.mxu0 %v3531_v5  ;;  %v3616_v4 = vld [vmem:[#allocation5 + $0x738] ss:$48 sps:$4 sm:$0xff]   ;;  %v3621_v5 = vld [vmem:[#allocation5 + $0x3dc] ss:$48 sps:$4 sm:$0xff]  }
  0xea   :  { %2208 = vmatprep.subr.bf16.mxu1 %v3534_v6  ;;  %v3624_v6 = vld [vmem:[#allocation5 + $0x79c] ss:$48 sps:$4 sm:$0xff]  }
  0xec   :  { %2168 = vmatpush1.bf16.msra.mxu0 %v3529_v8  ;;  %v3619_v8 = vld [vmem:[#allocation5 + $0x3d8] ss:$48 sps:$4 sm:$0xff]  }
  0xed   :  { %2209 = vmatpush1.bf16.msra.mxu1 %v3532_v9  ;;  %2169 = vmatprep.subr.bf16.mxu0 %v3537_v10  ;;  %v3622_v9 = vld [vmem:[#allocation5 + $0x798] ss:$48 sps:$4 sm:$0xff]   ;;  %v3627_v10 = vld [vmem:[#allocation5 + $0x43c] ss:$48 sps:$4 sm:$0xff]  }
  0xee   :  { %2210 = vmatprep.subr.bf16.mxu1 %v3540_v11  ;;  %v3630_v11 = vld [vmem:[#allocation5 + $0x7fc] ss:$48 sps:$4 sm:$0xff]  }
  0xf0   :  { %2170 = vmatpush1.bf16.msra.mxu0 %v3535_v12  ;;  %v3625_v12 = vld [vmem:[#allocation5 + $0x438] ss:$48 sps:$4 sm:$0xff]  }
  0xf1   :  { %2211 = vmatpush1.bf16.msra.mxu1 %v3538_v13  ;;  %2171 = vmatprep.subr.bf16.mxu0 %v3543_v14  ;;  %v3628_v13 = vld [vmem:[#allocation5 + $0x7f8] ss:$48 sps:$4 sm:$0xff]   ;;  %v3633_v14 = vld [vmem:[#allocation5 + $0x49c] ss:$48 sps:$4 sm:$0xff]  }
  0xf2   :  { %2212 = vmatprep.subr.bf16.mxu1 %v3546_v15  ;;  %v3636_v15 = vld [vmem:[#allocation5 + $0x85c] ss:$48 sps:$4 sm:$0xff]  }
  0xf4   :  { %2172 = vmatpush1.bf16.msra.mxu0 %v3541_v16  ;;  %v3631_v16 = vld [vmem:[#allocation5 + $0x498] ss:$48 sps:$4 sm:$0xff]  }
  0xf5   :  { %2213 = vmatpush1.bf16.msra.mxu1 %v3544_v17  ;;  %2173 = vmatprep.subr.bf16.mxu0 %v3549_v18  ;;  %v3634_v17 = vld [vmem:[#allocation5 + $0x858] ss:$48 sps:$4 sm:$0xff]   ;;  %v3639_v18 = vld [vmem:[#allocation5 + $0x4fc] ss:$48 sps:$4 sm:$0xff]  }
  0xf6   :  { %2214 = vmatprep.subr.bf16.mxu1 %v3552_v19  ;;  %v3642_v19 = vld [vmem:[#allocation5 + $0x8bc] ss:$48 sps:$4 sm:$0xff]  }
  0xf8   :  { %2174 = vmatpush1.bf16.msra.mxu0 %v3547_v20  ;;  %v3637_v20 = vld [vmem:[#allocation5 + $0x4f8] ss:$48 sps:$4 sm:$0xff]  }
  0xf9   :  { %2215 = vmatpush1.bf16.msra.mxu1 %v3550_v21  ;;  %2175 = vmatprep.subr.bf16.mxu0 %v3555_v22  ;;  %v3640_v21 = vld [vmem:[#allocation5 + $0x8b8] ss:$48 sps:$4 sm:$0xff]   ;;  %v3645_v22 = vld [vmem:[#allocation5 + $0x55c] ss:$48 sps:$4 sm:$0xff]  }
  0xfa   :  { %2216 = vmatprep.subr.bf16.mxu1 %v3558_v23  ;;  %v3648_v23 = vld [vmem:[#allocation5 + $0x91c] ss:$48 sps:$4 sm:$0xff]  }
  0xfc   :  { %2176 = vmatpush1.bf16.msra.mxu0 %v3553_v24  ;;  %v3643_v24 = vld [vmem:[#allocation5 + $0x558] ss:$48 sps:$4 sm:$0xff]  }
  0xfd   :  { %2217 = vmatpush1.bf16.msra.mxu1 %v3556_v25  ;;  %2177 = vmatprep.subr.bf16.mxu0 %v3561_v26  ;;  %v3646_v25 = vld [vmem:[#allocation5 + $0x918] ss:$48 sps:$4 sm:$0xff]   ;;  %v3651_v26 = vld [vmem:[#allocation5 + $0x5bc] ss:$48 sps:$4 sm:$0xff]  }
  0xfe   :  { %2239 = vmatprep.subr.bf16.mxu1 %v3564_v27  ;;  %v3654_v27 = vld [vmem:[#allocation5 + $0x97c] ss:$48 sps:$4 sm:$0xff]  }
 0x100   :  { %2231 = vmatmul.mubr.bf16.vlgmr.msra.gmra.mrb[8].mxu1 %v4128_v44  ;;  %2178 = vmatpush1.bf16.msra.mxu0 %v3559_v28  ;;  %v3649_v28 = vld [vmem:[#allocation5 + $0x5b8] ss:$48 sps:$4 sm:$0xff]  }
 0x101   :  { %2240 = vmatpush1.bf16.msra.mxu1 %v3562_v29  ;;  %2179 = vmatprep.subr.bf16.mxu0 %v3567_v30  ;;  %v3652_v29 = vld [vmem:[#allocation5 + $0x978] ss:$48 sps:$4 sm:$0xff]   ;;  %v3657_v30 = vld [vmem:[#allocation5 + $0x24] ss:$48 sps:$4 sm:$0xff]  }
 0x102   :  { %2241 = vmatprep.subr.bf16.mxu1 %v3570_v31  ;;  %2271 = vmatprep.mubr.bf16.mxu1 %v4131_v52  ;;  %v3660_v31 = vld [vmem:[#allocation5 + $0x624] ss:$48 sps:$4 sm:$0xff]  }
 0x104   :  { %2180 = vmatpush1.bf16.msra.mxu0 %v3565_v33  ;;  %v3655_v33 = vld [vmem:[#allocation5 + $0x20] ss:$48 sps:$4 sm:$0xff]  }
 0x105   :  { %2242 = vmatpush1.bf16.msra.mxu1 %v3568_v34  ;;  %2181 = vmatprep.subr.bf16.mxu0 %v3573_v35  ;;  %v3658_v34 = vld [vmem:[#allocation5 + $0x620] ss:$48 sps:$4 sm:$0xff]   ;;  %v3663_v35 = vld [vmem:[#allocation5 + $0x84] ss:$48 sps:$4 sm:$0xff]  }
 0x106   :  { %2243 = vmatprep.subr.bf16.mxu1 %v3576_v36  ;;  %v3666_v36 = vld [vmem:[#allocation5 + $0x684] ss:$48 sps:$4 sm:$0xff]  }
 0x108   :  { %2182 = vmatpush1.bf16.msra.mxu0 %v3571_v37  ;;  %v3661_v37 = vld [vmem:[#allocation5 + $0x80] ss:$48 sps:$4 sm:$0xff]  }
 0x109   :  { %2244 = vmatpush1.bf16.msra.mxu1 %v3574_v38  ;;  %2183 = vmatprep.subr.bf16.mxu0 %v3579_v39  ;;  %v3664_v38 = vld [vmem:[#allocation5 + $0x680] ss:$48 sps:$4 sm:$0xff]   ;;  %v3669_v39 = vld [vmem:[#allocation5 + $0xe4] ss:$48 sps:$4 sm:$0xff]  }
 0x10a   :  { %2245 = vmatprep.subr.bf16.mxu1 %v3582_v40  ;;  %v3672_v40 = vld [vmem:[#allocation5 + $0x6e4] ss:$48 sps:$4 sm:$0xff]  }
 0x10c   :  { %2184 = vmatpush1.bf16.msra.mxu0 %v3577_v41  ;;  %v3667_v41 = vld [vmem:[#allocation5 + $0xe0] ss:$48 sps:$4 sm:$0xff]  }
 0x10d   :  { %2246 = vmatpush1.bf16.msra.mxu1 %v3580_v42  ;;  %2185 = vmatprep.subr.bf16.mxu0 %v3585_v43  ;;  %v3670_v42 = vld [vmem:[#allocation5 + $0x6e0] ss:$48 sps:$4 sm:$0xff]   ;;  %v3675_v43 = vld [vmem:[#allocation5 + $0x144] ss:$48 sps:$4 sm:$0xff]  }
 0x10e   :  { %2247 = vmatprep.subr.bf16.mxu1 %v3588_v45  ;;  %v3678_v45 = vld [vmem:[#allocation5 + $0x744] ss:$48 sps:$4 sm:$0xff]  }
 0x110   :  { %2186 = vmatpush1.bf16.msra.mxu0 %v3583_v46  ;;  %v3673_v46 = vld [vmem:[#allocation5 + $0x140] ss:$48 sps:$4 sm:$0xff]  }
 0x111   :  { %2248 = vmatpush1.bf16.msra.mxu1 %v3586_v47  ;;  %2187 = vmatprep.subr.bf16.mxu0 %v3591_v48  ;;  %v3676_v47 = vld [vmem:[#allocation5 + $0x740] ss:$48 sps:$4 sm:$0xff]   ;;  %v3681_v48 = vld [vmem:[#allocation5 + $0x1a4] ss:$48 sps:$4 sm:$0xff]  }
 0x112   :  { %2249 = vmatprep.subr.bf16.mxu1 %v3594_v49  ;;  %v3684_v49 = vld [vmem:[#allocation5 + $0x7a4] ss:$48 sps:$4 sm:$0xff]  }
 0x114   :  { %2188 = vmatpush1.bf16.msra.mxu0 %v3589_v50  ;;  %v3679_v50 = vld [vmem:[#allocation5 + $0x1a0] ss:$48 sps:$4 sm:$0xff]  }
 0x115   :  { %2250 = vmatpush1.bf16.msra.mxu1 %v3592_v51  ;;  %2280 = vmatprep.subr.bf16.mxu0 %v3600_v54  ;;  %v3682_v51 = vld [vmem:[#allocation5 + $0x7a0] ss:$48 sps:$4 sm:$0xff]   ;;  %v3690_v54 = vld [vmem:[#allocation5 + $0x804] ss:$48 sps:$4 sm:$0xff]  }
 0x116   :  { %2251 = vmatprep.subr.bf16.mxu1 %v3597_v53  ;;  %v3687_v53 = vld [vmem:[#allocation5 + $0x204] ss:$48 sps:$4 sm:$0xff]  }
 0x117   :  { %2190 = vmatmul.mubr.bf16.vlgmr.msra.gmra.mrb[8].mxu0 %v4135_v7 }
 0x118   :  { %2281 = vmatpush1.bf16.msra.mxu0 %v3598_v56  ;;  %3295 = vmatprep.mubr.msk.bf16.mxu0 %vm1989_vm0, %v4124_v32  ;;  %v3688_v56 = vld [vmem:[#allocation5 + $0x800] ss:$48 sps:$4 sm:$0xff]  }
 0x119   :  { %2252 = vmatpush1.bf16.msra.mxu1 %v3595_v55  ;;  %2282 = vmatprep.subr.bf16.mxu0 %v3606_v58  ;;  %v3685_v55 = vld [vmem:[#allocation5 + $0x200] ss:$48 sps:$4 sm:$0xff]   ;;  %v3696_v58 = vld [vmem:[#allocation5 + $0x864] ss:$48 sps:$4 sm:$0xff]  }
 0x11a   :  { %2253 = vmatprep.subr.bf16.mxu1 %v3603_v57  ;;  %v3693_v57 = vld [vmem:[#allocation5 + $0x264] ss:$48 sps:$4 sm:$0xff]  }
 0x11c   :  { %2283 = vmatpush1.bf16.msra.mxu0 %v3604_v60  ;;  %v3694_v60 = vld [vmem:[#allocation5 + $0x860] ss:$48 sps:$4 sm:$0xff]  }
 0x11d   :  { %2254 = vmatpush1.bf16.msra.mxu1 %v3601_v59  ;;  %2284 = vmatprep.subr.bf16.mxu0 %v3612_v62  ;;  %v3691_v59 = vld [vmem:[#allocation5 + $0x260] ss:$48 sps:$4 sm:$0xff]   ;;  %v3702_v62 = vld [vmem:[#allocation5 + $0x8c4] ss:$48 sps:$4 sm:$0xff]  }
 0x11e   :  { %2255 = vmatprep.subr.bf16.mxu1 %v3609_v61  ;;  %v3699_v61 = vld [vmem:[#allocation5 + $0x2c4] ss:$48 sps:$4 sm:$0xff]  }
 0x120   :  { %2285 = vmatpush1.bf16.msra.mxu0 %v3610_v0  ;;  %v3700_v0 = vld [vmem:[#allocation5 + $0x8c0] ss:$48 sps:$4 sm:$0xff]  }
 0x121   :  { %2256 = vmatpush1.bf16.msra.mxu1 %v3607_v63  ;;  %2286 = vmatprep.subr.bf16.mxu0 %v3618_v2  ;;  %v3697_v63 = vld [vmem:[#allocation5 + $0x2c0] ss:$48 sps:$4 sm:$0xff]   ;;  %v3708_v2 = vld [vmem:[#allocation5 + $0x924] ss:$48 sps:$4 sm:$0xff]  }
 0x122   :  { %2257 = vmatprep.subr.bf16.mxu1 %v3615_v1  ;;  %v3705_v1 = vld [vmem:[#allocation5 + $0x324] ss:$48 sps:$4 sm:$0xff]  }
 0x124   :  { %2287 = vmatpush1.bf16.msra.mxu0 %v3616_v4  ;;  %v3706_v4 = vld [vmem:[#allocation5 + $0x920] ss:$48 sps:$4 sm:$0xff]  }
 0x125   :  { %2258 = vmatpush1.bf16.msra.mxu1 %v3613_v3  ;;  %2288 = vmatprep.subr.bf16.mxu0 %v3624_v6  ;;  %v3703_v3 = vld [vmem:[#allocation5 + $0x320] ss:$48 sps:$4 sm:$0xff]   ;;  %v3714_v6 = vld [vmem:[#allocation5 + $0x984] ss:$48 sps:$4 sm:$0xff]  }
 0x126   :  { %2259 = vmatprep.subr.bf16.mxu1 %v3621_v5  ;;  %v3711_v5 = vld [vmem:[#allocation5 + $0x384] ss:$48 sps:$4 sm:$0xff]  }
 0x128   :  { %2289 = vmatpush1.bf16.msra.mxu0 %v3622_v9  ;;  %v3712_v9 = vld [vmem:[#allocation5 + $0x980] ss:$48 sps:$4 sm:$0xff]  }
 0x129   :  { %2260 = vmatpush1.bf16.msra.mxu1 %v3619_v8  ;;  %2290 = vmatprep.subr.bf16.mxu0 %v3630_v11  ;;  %v3709_v8 = vld [vmem:[#allocation5 + $0x380] ss:$48 sps:$4 sm:$0xff]   ;;  %v3720_v11 = vld [vmem:[#allocation5 + $0x2c] ss:$48 sps:$4 sm:$0xff]  }
 0x12a   :  { %2261 = vmatprep.subr.bf16.mxu1 %v3627_v10  ;;  %v3717_v10 = vld [vmem:[#allocation5 + $0x3e4] ss:$48 sps:$4 sm:$0xff]  }
 0x12c   :  { %2291 = vmatpush1.bf16.msra.mxu0 %v3628_v13  ;;  %v3718_v13 = vld [vmem:[#allocation5 + $0x28] ss:$48 sps:$4 sm:$0xff]  }
 0x12d   :  { %2262 = vmatpush1.bf16.msra.mxu1 %v3625_v12  ;;  %2292 = vmatprep.subr.bf16.mxu0 %v3636_v15  ;;  %v3715_v12 = vld [vmem:[#allocation5 + $0x3e0] ss:$48 sps:$4 sm:$0xff]   ;;  %v3726_v15 = vld [vmem:[#allocation5 + $0x8c] ss:$48 sps:$4 sm:$0xff]  }
 0x12e   :  { %2263 = vmatprep.subr.bf16.mxu1 %v3633_v14  ;;  %v3723_v14 = vld [vmem:[#allocation5 + $0x444] ss:$48 sps:$4 sm:$0xff]  }
 0x130   :  { %2293 = vmatpush1.bf16.msra.mxu0 %v3634_v17  ;;  %v3724_v17 = vld [vmem:[#allocation5 + $0x88] ss:$48 sps:$4 sm:$0xff]  }
 0x131   :  { %2264 = vmatpush1.bf16.msra.mxu1 %v3631_v16  ;;  %2294 = vmatprep.subr.bf16.mxu0 %v3642_v19  ;;  %v3721_v16 = vld [vmem:[#allocation5 + $0x440] ss:$48 sps:$4 sm:$0xff]   ;;  %v3732_v19 = vld [vmem:[#allocation5 + $0xec] ss:$48 sps:$4 sm:$0xff]  }
 0x132   :  { %2265 = vmatprep.subr.bf16.mxu1 %v3639_v18  ;;  %v3729_v18 = vld [vmem:[#allocation5 + $0x4a4] ss:$48 sps:$4 sm:$0xff]  }
 0x134   :  { %2295 = vmatpush1.bf16.msra.mxu0 %v3640_v21 }
 0x135   :  { %2266 = vmatpush1.bf16.msra.mxu1 %v3637_v20  ;;  %2296 = vmatprep.subr.bf16.mxu0 %v3648_v23  ;;  %v3727_v23 = vld [vmem:[#allocation5 + $0x4a0] ss:$48 sps:$4 sm:$0xff]  }
 0x136   :  { %2267 = vmatprep.subr.bf16.mxu1 %v3645_v22 }
 0x138   :  { %2297 = vmatpush1.bf16.msra.mxu0 %v3646_v25 }
 0x139   :  { %2268 = vmatpush1.bf16.msra.mxu1 %v3643_v24  ;;  %2298 = vmatprep.subr.bf16.mxu0 %v3654_v27  ;;  %v3730_v24 = vld [vmem:[#allocation5 + $0xe8] ss:$48 sps:$4 sm:$0xff]   ;;  %v3738_v27 = vld [vmem:[#allocation5 + $0x14c] ss:$48 sps:$4 sm:$0xff]  }
 0x13a   :  { %2269 = vmatprep.subr.bf16.mxu1 %v3651_v26  ;;  %v3735_v26 = vld [vmem:[#allocation5 + $0x504] ss:$48 sps:$4 sm:$0xff]  }
 0x13c   :  { %2299 = vmatpush1.bf16.msra.mxu0 %v3652_v29  ;;  %v3736_v29 = vld [vmem:[#allocation5 + $0x148] ss:$48 sps:$4 sm:$0xff]  }
 0x13d   :  { %2270 = vmatpush1.bf16.msra.mxu1 %v3649_v28  ;;  %2321 = vmatprep.subr.bf16.mxu0 %v3657_v30  ;;  %v3733_v28 = vld [vmem:[#allocation5 + $0x500] ss:$48 sps:$4 sm:$0xff]   ;;  %v3741_v30 = vld [vmem:[#allocation5 + $0x564] ss:$48 sps:$4 sm:$0xff]  }
 0x13e   :  { %2362 = vmatprep.subr.bf16.mxu1 %v3660_v31  ;;  %v3739_v31 = vld [vmem:[#allocation5 + $0x560] ss:$48 sps:$4 sm:$0xff]  }
 0x13f   :  { %2313 = vmatmul.mubr.bf16.vlgmr.msra.gmra.mrb[12].mxu0 %v4128_v44 }
 0x140   :  { %2272 = vmatmul.mubr.bf16.vlgmr.msra.gmra.mrb[12].mxu1 %v4135_v7  ;;  %2322 = vmatpush1.bf16.msra.mxu0 %v3655_v33  ;;  %v3742_v33 = vld [vmem:[#allocation5 + $0x1a8] ss:$48 sps:$4 sm:$0xff]  }
 0x141   :  { %2363 = vmatpush1.bf16.msra.mxu1 %v3658_v34  ;;  %2323 = vmatprep.subr.bf16.mxu0 %v3663_v35  ;;  %v3747_v34 = vld [vmem:[#allocation5 + $0x5c4] ss:$48 sps:$4 sm:$0xff]   ;;  %v3750_v35 = vld [vmem:[#allocation5 + $0x20c] ss:$48 sps:$4 sm:$0xff]  }
 0x142   :  { %2364 = vmatprep.subr.bf16.mxu1 %v3666_v36  ;;  %3296 = vmatprep.mubr.msk.bf16.mxu1 %vm1989_vm0, %v4124_v32  ;;  %v2489_v36 = vlaneseq }
 0x143   :  { %2353 = vmatprep.mubr.bf16.mxu0 %v4131_v52 }
 0x144   :  { %2324 = vmatpush1.bf16.msra.mxu0 %v3661_v37  ;;  %v3745_v37 = vld [vmem:[#allocation5 + $0x5c0] ss:$48 sps:$4 sm:$0xff]  }
 0x145   :  { %2365 = vmatpush1.bf16.msra.mxu1 %v3664_v38  ;;  %2325 = vmatprep.subr.bf16.mxu0 %v3669_v39  ;;  %v3748_v38 = vld [vmem:[#allocation5 + $0x208] ss:$48 sps:$4 sm:$0xff]   ;;  %v3753_v39 = vld [vmem:[#allocation5 + $0x26c] ss:$48 sps:$4 sm:$0xff]  }
 0x146   :  { %2366 = vmatprep.subr.bf16.mxu1 %v3672_v40  ;;  %v3756_v40 = vld [vmem:[#allocation5 + $0x62c] ss:$48 sps:$4 sm:$0xff]  }
 0x148   :  { %2326 = vmatpush1.bf16.msra.mxu0 %v3667_v41  ;;  %v4161_v41 = vshrl.u32 %v2489_v36, 7 }
 0x149   :  { %2367 = vmatpush1.bf16.msra.mxu1 %v3670_v42  ;;  %2327 = vmatprep.subr.bf16.mxu0 %v3675_v43  ;;  %v3751_v42 = vld [vmem:[#allocation5 + $0x268] ss:$48 sps:$4 sm:$0xff]  }
 0x14a   :  { %2368 = vmatprep.subr.bf16.mxu1 %v3678_v45  ;;  %v3754_v43 = vld [vmem:[#allocation5 + $0x628] ss:$48 sps:$4 sm:$0xff]   ;;  %v4164_v45 = vsub.s32 0, %v4161_v41 }
 0x14c   :  { %2328 = vmatpush1.bf16.msra.mxu0 %v3673_v46  ;;  %v3759_v46 = vld [vmem:[#allocation5 + $0x2cc] ss:$48 sps:$4 sm:$0xff]  }
 0x14d   :  { %2369 = vmatpush1.bf16.msra.mxu1 %v3676_v47  ;;  %2329 = vmatprep.subr.bf16.mxu0 %v3681_v48  ;;  %v3762_v47 = vld [vmem:[#allocation5 + $0x68c] ss:$48 sps:$4 sm:$0xff]   ;;  %v4166_v48 = vld [vmem:[#allocation7] sm:$0xff] }
 0x14e   :  { %2370 = vmatprep.subr.bf16.mxu1 %v3684_v49  ;;  %v4169_v49 = vsub.s32 1, %v4161_v41 }
 0x150   :  { %2330 = vmatpush1.bf16.msra.mxu0 %v3679_v50  ;;  %v3757_v50 = vld [vmem:[#allocation5 + $0x2c8] ss:$48 sps:$4 sm:$0xff]  }
 0x151   :  { %2371 = vmatpush1.bf16.msra.mxu1 %v3682_v51  ;;  %2331 = vmatprep.subr.bf16.mxu0 %v3687_v53  ;;  %v3760_v51 = vld [vmem:[#allocation5 + $0x688] ss:$48 sps:$4 sm:$0xff]   ;;  %v2492_v53 = vrot.slane %v4166_v48, %v4164_v45 }
 0x152   :  { %2372 = vmatprep.subr.bf16.mxu1 %v3690_v54  ;;  %v3765_v54 = vld [vmem:[#allocation5 + $0x32c] ss:$48 sps:$4 sm:$0xff]  }
 0x154   :  { %2332 = vmatpush1.bf16.msra.mxu0 %v3685_v55  ;;  %v3768_v55 = vld [vmem:[#allocation5 + $0x6ec] ss:$48 sps:$4 sm:$0xff]  }
 0x155   :  { %2373 = vmatpush1.bf16.msra.mxu1 %v3688_v56  ;;  %2333 = vmatprep.subr.bf16.mxu0 %v3693_v57  ;;  %v2496_v57 = vrot.slane %v4166_v48, %v4169_v49 }
 0x156   :  { %2374 = vmatprep.subr.bf16.mxu1 %v3696_v58 }
 0x158   :  { %2334 = vmatpush1.bf16.msra.mxu0 %v3691_v59 }
 0x159   :  { %2375 = vmatpush1.bf16.msra.mxu1 %v3694_v60  ;;  %2335 = vmatprep.subr.bf16.mxu0 %v3699_v61 }
 0x15a   :  { %2376 = vmatprep.subr.bf16.mxu1 %v3702_v62  ;;  %v3763_v62 = vld [vmem:[#allocation5 + $0x328] ss:$48 sps:$4 sm:$0xff]  }
 0x15c   :  { %2336 = vmatpush1.bf16.msra.mxu0 %v3697_v63  ;;  %v3766_v63 = vld [vmem:[#allocation5 + $0x6e8] ss:$48 sps:$4 sm:$0xff]  }
 0x15d   :  { %2377 = vmatpush1.bf16.msra.mxu1 %v3700_v0  ;;  %2337 = vmatprep.subr.bf16.mxu0 %v3705_v1 }
 0x15e   :  { %2378 = vmatprep.subr.bf16.mxu1 %v3708_v2  ;;  %v3771_v2 = vld [vmem:[#allocation5 + $0x38c] ss:$48 sps:$4 sm:$0xff]  }
 0x160   :  { %2338 = vmatpush1.bf16.msra.mxu0 %v3703_v3  ;;  %v3774_v3 = vld [vmem:[#allocation5 + $0x74c] ss:$48 sps:$4 sm:$0xff]  }
 0x161   :  { %2379 = vmatpush1.bf16.msra.mxu1 %v3706_v4  ;;  %2339 = vmatprep.subr.bf16.mxu0 %v3711_v5  ;;  %v3772_v5 = vld [vmem:[#allocation5 + $0x748] ss:$48 sps:$4 sm:$0xff]  }
 0x162   :  { %2380 = vmatprep.subr.bf16.mxu1 %v3714_v6  ;;  %v3777_v6 = vld [vmem:[#allocation5 + $0x3ec] ss:$48 sps:$4 sm:$0xff]  }
 0x164   :  { %2340 = vmatpush1.bf16.msra.mxu0 %v3709_v8  ;;  %v3780_v8 = vld [vmem:[#allocation5 + $0x7ac] ss:$48 sps:$4 sm:$0xff]  }
 0x165   :  { %2381 = vmatpush1.bf16.msra.mxu1 %v3712_v9  ;;  %2341 = vmatprep.subr.bf16.mxu0 %v3717_v10  ;;  %v3775_v9 = vld [vmem:[#allocation5 + $0x3e8] ss:$48 sps:$4 sm:$0xff]  }
 0x166   :  { %2403 = vmatprep.subr.bf16.mxu1 %v3720_v11  ;;  %v3778_v10 = vld [vmem:[#allocation5 + $0x7a8] ss:$48 sps:$4 sm:$0xff]   ;;  %v3783_v11 = vld [vmem:[#allocation5 + $0x44c] ss:$48 sps:$4 sm:$0xff]  }
 0x168   :  { %2395 = vmatmul.mubr.bf16.vlgmr.msra.gmra.mrb[16].mxu1 %v4128_v44  ;;  %2342 = vmatpush1.bf16.msra.mxu0 %v3715_v12  ;;  %v3786_v12 = vld [vmem:[#allocation5 + $0x80c] ss:$48 sps:$4 sm:$0xff]  }
 0x169   :  { %2404 = vmatpush1.bf16.msra.mxu1 %v3718_v13  ;;  %2343 = vmatprep.subr.bf16.mxu0 %v3723_v14  ;;  %v3781_v13 = vld [vmem:[#allocation5 + $0x448] ss:$48 sps:$4 sm:$0xff]  }
 0x16a   :  { %2405 = vmatprep.subr.bf16.mxu1 %v3726_v15  ;;  %2435 = vmatprep.mubr.bf16.mxu1 %v4131_v52  ;;  %v3744_v52 = vld [vmem:[#allocation5 + $0x1ac] ss:$48 sps:$4 sm:$0xff]   ;;  %v3784_v14 = vld [vmem:[#allocation5 + $0x808] ss:$48 sps:$4 sm:$0xff]  }
 0x16b   :  { %v4156_v20 = vpop.f32.mrb[0].mxu1  ;;  %v3789_v15 = vld [vmem:[#allocation5 + $0x4ac] ss:$48 sps:$4 sm:$0xff]  }
 0x16c   :  { %v4159_v21 = vpop.f32.mrb[1].mxu1  ;;  %2344 = vmatpush1.bf16.msra.mxu0 %v3721_v16  ;;  %v3792_v16 = vld [vmem:[#allocation5 + $0x86c] ss:$48 sps:$4 sm:$0xff]  }
 0x16d   :  { %v2072_v22 = vpop.f32.mrb[2].mxu1  ;;  %2406 = vmatpush1.bf16.msra.mxu1 %v3724_v17  ;;  %2345 = vmatprep.subr.bf16.mxu0 %v3729_v18  ;;  %v3787_v17 = vld [vmem:[#allocation5 + $0x4a8] ss:$48 sps:$4 sm:$0xff]  }
 0x16e   :  { %v2073_v25 = vpop.f32.mrb[3].mxu1  ;;  %2407 = vmatprep.subr.bf16.mxu1 %v3732_v19  ;;  %v3790_v18 = vld [vmem:[#allocation5 + $0x868] ss:$48 sps:$4 sm:$0xff]   ;;  %v3795_v19 = vld [vmem:[#allocation5 + $0x50c] ss:$48 sps:$4 sm:$0xff]  }
 0x16f   :  { %v3796_v22 = vld [vmem:[#allocation5 + $0x8c8] ss:$48 sps:$4 sm:$0xff]  }
 0x170   :  { %2346 = vmatpush1.bf16.msra.mxu0 %v3727_v23  ;;  %v3801_v23 = vld [vmem:[#allocation5 + $0x56c] ss:$48 sps:$4 sm:$0xff]   ;;  %v3799_v25 = vld [vmem:[#allocation5 + $0x568] ss:$48 sps:$4 sm:$0xff]  }
 0x171   :  { %2408 = vmatpush1.bf16.msra.mxu1 %v3730_v24  ;;  %2347 = vmatprep.subr.bf16.mxu0 %v3735_v26  ;;  %v3804_v24 = vld [vmem:[#allocation5 + $0x92c] ss:$48 sps:$4 sm:$0xff]   ;;  %v3802_v26 = vld [vmem:[#allocation5 + $0x928] ss:$48 sps:$4 sm:$0xff]  }
 0x172   :  { %2409 = vmatprep.subr.bf16.mxu1 %v3738_v27  ;;  %v3807_v27 = vld [vmem:[#allocation5 + $0x5cc] ss:$48 sps:$4 sm:$0xff]  }
 0x174   :  { %2348 = vmatpush1.bf16.msra.mxu0 %v3733_v28  ;;  %v3810_v28 = vld [vmem:[#allocation5 + $0x98c] ss:$48 sps:$4 sm:$0xff]  }
 0x175   :  { %2410 = vmatpush1.bf16.msra.mxu1 %v3736_v29  ;;  %2349 = vmatprep.subr.bf16.mxu0 %v3741_v30  ;;  %v2574_v29 = vld [vmem:[#allocation10] sm:$0xff] }
 0x176   :  { %2411 = vmatprep.subr.bf16.mxu1 %v3744_v52  ;;  %v2578_v30 = vld [vmem:[#allocation10 + $0x20] sm:$0xff]  ;;  %v2575_v52 = vld [vmem:[#allocation10 + $0x8] sm:$0xff] }
 0x178   :  { %2350 = vmatpush1.bf16.msra.mxu0 %v3739_v31  ;;  %v2579_v31 = vld [vmem:[#allocation10 + $0x28] sm:$0xff] }
 0x179   :  { %2412 = vmatpush1.bf16.msra.mxu1 %v3742_v33  ;;  %2351 = vmatprep.subr.bf16.mxu0 %v3747_v34  ;;  %v3805_v33 = vld [vmem:[#allocation5 + $0x5c8] ss:$48 sps:$4 sm:$0xff]   ;;  %v3301_v36 = vcombine.high %v2575_v52, %v2579_v31 }
 0x17a   :  { %2413 = vmatprep.subr.bf16.mxu1 %v3750_v35  ;;  %v3808_v34 = vld [vmem:[#allocation5 + $0x988] ss:$48 sps:$4 sm:$0xff]   ;;  %v3299_v35 = vcombine.high %v2574_v29, %v2578_v30 }
 0x17c   :  { %2352 = vmatpush1.bf16.msra.mxu0 %v3745_v37  ;;  %v2582_v37 = vld [vmem:[#allocation10 + $0x40] sm:$0xff] }
 0x17d   :  { %2414 = vmatpush1.bf16.msra.mxu1 %v3748_v38  ;;  %2444 = vmatprep.subr.bf16.mxu0 %v3756_v40  ;;  %v2586_v38 = vld [vmem:[#allocation10 + $0x60] sm:$0xff]  ;;  %v2587_v40 = vld [vmem:[#allocation10 + $0x68] sm:$0xff] }
 0x17e   :  { %2415 = vmatprep.subr.bf16.mxu1 %v3753_v39  ;;  %v2583_v39 = vld [vmem:[#allocation10 + $0x48] sm:$0xff] }
 0x17f   :  { %2354 = vmatmul.mubr.bf16.vlgmr.msra.gmra.mrb[16].mxu0 %v4135_v7 }
 0x180   :  { %2445 = vmatpush1.bf16.msra.mxu0 %v3754_v43  ;;  %3297 = vmatprep.mubr.msk.bf16.mxu0 %vm1989_vm0, %v4124_v32  ;;  %v3769_v32 = vld [vmem:[#allocation5 + $0x388] ss:$48 sps:$4 sm:$0xff]   ;;  %v3300_v43 = vcombine.low %v2575_v52, %v2579_v31 }
 0x181   :  { %2416 = vmatpush1.bf16.msra.mxu1 %v3751_v42  ;;  %2446 = vmatprep.subr.bf16.mxu0 %v3762_v47  ;;  %v3298_v42 = vcombine.low %v2574_v29, %v2578_v30  ;;  %v3307_v47 = vcombine.high %v2582_v37, %v2586_v38  ;;  %v2593_v29 = vld [vmem:[#allocation10 + $0x98] sm:$0xff] }
 0x182   :  { %2417 = vmatprep.subr.bf16.mxu1 %v3759_v46  ;;  %v2027_v56 = vpop.f32.mrb[0].mxu0  ;;  %v4181_v46 = vsub.s32 2, %v4161_v41  ;;  %v2597_v30 = vld [vmem:[#allocation10 + $0xb8] sm:$0xff] }
 0x183   :  { %v2069_v58 = vadd.f32 %v4156_v20, %v2027_v56  ;;  %v2029_v59 = vpop.f32.mrb[1].mxu0  ;;  %v3798_v20 = vld [vmem:[#allocation5 + $0x8cc] ss:$48 sps:$4 sm:$0xff]  }
 0x184   :  { %v2071_v60 = vadd.f32 %v4159_v21, %v2029_v59  ;;  %v2031_v61 = vpop.f32.mrb[2].mxu0  ;;  %2447 = vmatpush1.bf16.msra.mxu0 %v3760_v51  ;;  %v3793_v21 = vld [vmem:[#allocation5 + $0x508] ss:$48 sps:$4 sm:$0xff]   ;;  %v2590_v51 = vld [vmem:[#allocation10 + $0x80] sm:$0xff]  ;;  %v2500_v59 = vrot.slane %v4166_v48, %v4181_v46 }
 0x185   :  { %2418 = vmatpush1.bf16.msra.mxu1 %v3757_v50  ;;  %v2549_v0 = vadd.f32 %v2492_v53, %v2069_v58  ;;  %v2032_v1 = vpop.f32.mrb[3].mxu0  ;;  %2448 = vmatprep.subr.bf16.mxu0 %v3768_v55  ;;  %v3309_v50 = vcombine.high %v2583_v39, %v2587_v40  ;;  %v4184_v53 = vsub.s32 3, %v4161_v41  ;;  %v2591_v55 = vld [vmem:[#allocation10 + $0x88] sm:$0xff]  ;;  %v3308_v58 = vcombine.low %v2583_v39, %v2587_v40 }
 0x186   :  { %2419 = vmatprep.subr.bf16.mxu1 %v3765_v54  ;;  %v2550_v4 = vadd.f32 %v2496_v57, %v2071_v60  ;;  %v2594_v54 = vld [vmem:[#allocation10 + $0xa0] sm:$0xff]  ;;  %v2595_v56 = vld [vmem:[#allocation10 + $0xa8] sm:$0xff]  ;;  %v3306_v57 = vcombine.low %v2582_v37, %v2586_v38 }
 0x187   :  { %2561 = vst [vmem:[#allocation13] sm:$0xff] %v2549_v0  ;;  %v3315_v60 = vcombine.high %v2590_v51, %v2594_v54  ;;  %v3317_v61 = vcombine.high %v2591_v55, %v2595_v56  ;;  %v2504_v1 = vrot.slane %v4166_v48, %v4184_v53 }
 0x188   :  { %2562 = vst [vmem:[#allocation13 + $0x8] sm:$0xff] %v2550_v4  ;;  %2449 = vmatpush1.bf16.msra.mxu0 %v3766_v63 }
 0x189   :  { %2420 = vmatpush1.bf16.msra.mxu1 %v3763_v62  ;;  %2450 = vmatprep.subr.bf16.mxu0 %v3774_v3  ;;  %v2576_v62 = vld [vmem:[#allocation10 + $0x10] sm:$0xff]  ;;  %v2581_v3 = vld [vmem:[#allocation10 + $0x38] sm:$0xff] }
 0x18a   :  { %2421 = vmatprep.subr.bf16.mxu1 %v3771_v2  ;;  %v2577_v2 = vld [vmem:[#allocation10 + $0x18] sm:$0xff] }
 0x18c   :  { %2451 = vmatpush1.bf16.msra.mxu0 %v3772_v5 }
 0x18d   :  { %2422 = vmatpush1.bf16.msra.mxu1 %v3769_v32  ;;  %2452 = vmatprep.subr.bf16.mxu0 %v3780_v8 }
 0x18e   :  { %2423 = vmatprep.subr.bf16.mxu1 %v3777_v6 }
 0x190   :  { %2453 = vmatpush1.bf16.msra.mxu0 %v3778_v10  ;;  %v3314_v10 = vcombine.low %v2590_v51, %v2594_v54 }
 0x191   :  { %2424 = vmatpush1.bf16.msra.mxu1 %v3775_v9  ;;  %2454 = vmatprep.subr.bf16.mxu0 %v3786_v12 }
 0x192   :  { %2425 = vmatprep.subr.bf16.mxu1 %v3783_v11  ;;  %v3316_v11 = vcombine.low %v2591_v55, %v2595_v56 }
 0x194   :  { %2455 = vmatpush1.bf16.msra.mxu0 %v3784_v14 }
 0x195   :  { %2426 = vmatpush1.bf16.msra.mxu1 %v3781_v13  ;;  %2456 = vmatprep.subr.bf16.mxu0 %v3792_v16  ;;  %v3305_v16 = vcombine.high %v2577_v2, %v2581_v3 }
 0x196   :  { %2427 = vmatprep.subr.bf16.mxu1 %v3789_v15 }
 0x198   :  { %2457 = vmatpush1.bf16.msra.mxu0 %v3790_v18 }
 0x199   :  { %2428 = vmatpush1.bf16.msra.mxu1 %v3787_v17  ;;  %2458 = vmatprep.subr.bf16.mxu0 %v3798_v20  ;;  %v2584_v17 = vld [vmem:[#allocation10 + $0x50] sm:$0xff]  ;;  %v2585_v20 = vld [vmem:[#allocation10 + $0x58] sm:$0xff] }
 0x19a   :  { %2429 = vmatprep.subr.bf16.mxu1 %v3795_v19  ;;  %v2588_v19 = vld [vmem:[#allocation10 + $0x70] sm:$0xff] }
 0x19b   :  { %v3310_v52 = vcombine.low %v2584_v17, %v2588_v19 }
 0x19c   :  { %2459 = vmatpush1.bf16.msra.mxu0 %v3796_v22  ;;  %v2573_v22 = vld [vmem:[#allocation8] sm:$0xf] }
 0x19d   :  { %2430 = vmatpush1.bf16.msra.mxu1 %v3793_v21  ;;  %2460 = vmatprep.subr.bf16.mxu0 %v3804_v24  ;;  %v2589_v21 = vld [vmem:[#allocation10 + $0x78] sm:$0xff]  ;;  %v3304_v24 = vcombine.low %v2577_v2, %v2581_v3 }
 0x19e   :  { %2431 = vmatprep.subr.bf16.mxu1 %v3801_v23  ;;  %v3312_v31 = vcombine.low %v2585_v20, %v2589_v21 }
 0x1a0   :  { %2461 = vmatpush1.bf16.msra.mxu0 %v3802_v26  ;;  %v3313_v26 = vcombine.high %v2585_v20, %v2589_v21 }
 0x1a1   :  { %2432 = vmatpush1.bf16.msra.mxu1 %v3799_v25  ;;  %2462 = vmatprep.subr.bf16.mxu0 %v3810_v28  ;;  %v3311_v25 = vcombine.high %v2584_v17, %v2588_v19  ;;  %v2596_v28 = vld [vmem:[#allocation10 + $0xb0] sm:$0xff] }
 0x1a2   :  { %2433 = vmatprep.subr.bf16.mxu1 %v3807_v27  ;;  %v2592_v27 = vld [vmem:[#allocation10 + $0x90] sm:$0xff] }
 0x1a4   :  { %2463 = vmatpush1.bf16.msra.mxu0 %v3808_v34  ;;  %v3321_v34 = vcombine.high %v2593_v29, %v2597_v30 }
 0x1a5   :  { %2434 = vmatpush1.bf16.msra.mxu1 %v3805_v33  ;;  %2722 = vmatprep.subr.bf16.mxu0 %v3299_v35  ;;  %v3319_v33 = vcombine.high %v2592_v27, %v2596_v28  ;;  %v3318_v35 = vcombine.low %v2592_v27, %v2596_v28 }
 0x1a6   :  { %2763 = vmatprep.subr.bf16.mxu1 %v3301_v36  ;;  %v3320_v36 = vcombine.low %v2593_v29, %v2597_v30 }
 0x1a7   :  { %2477 = vmatmul.mubr.bf16.vlgmr.msra.gmra.mrb[20].mxu0 %v4128_v44  ;;  %v2580_v44 = vld [vmem:[#allocation10 + $0x30] sm:$0xff] }
 0x1a8   :  { %2436 = vmatmul.mubr.bf16.vlgmr.msra.gmra.mrb[20].mxu1 %v4135_v7  ;;  %2723 = vmatpush1.bf16.msra.mxu0 %v3298_v42  ;;  %v4009_v7 = vmov 0   ;;  %v3303_v15 = vcombine.high %v2576_v62, %v2580_v44  ;;  %v3302_v23 = vcombine.low %v2576_v62, %v2580_v44  ;;  %v2507_v42 = vsub.s32 4, %v4161_v41 }
 0x1a9   :  { %2764 = vmatpush1.bf16.msra.mxu1 %v3300_v43  ;;  %2724 = vmatprep.subr.bf16.mxu0 %v3307_v47  ;;  %v2511_v43 = vsub.s32 5, %v4161_v41  ;;  %v2519_v62 = vsub.s32 7, %v4161_v41 }
 0x1aa   :  { %2765 = vmatprep.subr.bf16.mxu1 %v3309_v50  ;;  %v2150_v0 = vpop.f32.mrb[4].mxu0  ;;  %2754 = vmatprep.mubr.bf16.mxu0 %v4009_v7  ;;  %v2508_v47 = vrot.slane %v4166_v48, %v2507_v42 }
 0x1ab   :  { %v2109_v63 = vpop.f32.mrb[4].mxu1  ;;  %2795 = vmatprep.mubr.bf16.mxu1 %v4009_v7  ;;  %v2152_v5 = vpop.f32.mrb[5].mxu0  ;;  %v2512_v51 = vrot.slane %v4166_v48, %v2511_v43 }
 0x1ac   :  { %v2151_v4 = vadd.f32 %v2150_v0, %v2109_v63  ;;  %v2111_v32 = vpop.f32.mrb[5].mxu1  ;;  %v2154_v9 = vpop.f32.mrb[6].mxu0  ;;  %2725 = vmatpush1.bf16.msra.mxu0 %v3306_v57 }
 0x1ad   :  { %v2153_v6 = vadd.f32 %v2152_v5, %v2111_v32  ;;  %v2113_v8 = vpop.f32.mrb[6].mxu1  ;;  %2766 = vmatpush1.bf16.msra.mxu1 %v3308_v58  ;;  %v2155_v14 = vpop.f32.mrb[7].mxu0  ;;  %2726 = vmatprep.subr.bf16.mxu0 %v3315_v60 }
 0x1ae   :  { %v2551_v12 = vadd.f32 %v2500_v59, %v2151_v4  ;;  %v2114_v13 = vpop.f32.mrb[7].mxu1  ;;  %2767 = vmatprep.subr.bf16.mxu1 %v3317_v61  ;;  %v2515_v61 = vsub.s32 6, %v4161_v41 }
 0x1af   :  { %v2552_v18 = vadd.f32 %v2504_v1, %v2153_v6 }
 0x1b0   :  { %2563 = vst [vmem:[#allocation13 + $0x10] sm:$0xff] %v2551_v12  ;;  %2727 = vmatpush1.bf16.msra.mxu0 %v3314_v10  ;;  %v2516_v63 = vrot.slane %v4166_v48, %v2515_v61 }
 0x1b1   :  { %2564 = vst [vmem:[#allocation13 + $0x18] sm:$0xff] %v2552_v18  ;;  %2768 = vmatpush1.bf16.msra.mxu1 %v3316_v11  ;;  %2804 = vmatprep.subr.bf16.mxu0 %v3303_v15  ;;  %v2486_v15 = vld [vmem:[#allocation7 + $0x8] sm:$0xf] }
 0x1b2   :  { %2845 = vmatprep.subr.bf16.mxu1 %v3305_v16  ;;  %v2524_v16 = vrot.slane %v2486_v15, %v4164_v45  ;;  %v2528_v17 = vrot.slane %v2486_v15, %v4169_v49  ;;  %v2536_v28 = vrot.slane %v2486_v15, %v4184_v53 }
 0x1b3   :  { %3322 = vmatmul.mubr.msk.bf16.vlgmr.msra.gmra.mrb[24].mxu0 %vm2718_vm1, %v2573_v22 }
 0x1b4   :  { %3323 = vmatmul.mubr.msk.bf16.vlgmr.msra.gmra.mrb[24].mxu1 %vm2718_vm1, %v2573_v22  ;;  %2805 = vmatpush1.bf16.msra.mxu0 %v3302_v23 }
 0x1b5   :  { %2846 = vmatpush1.bf16.msra.mxu1 %v3304_v24  ;;  %2806 = vmatprep.subr.bf16.mxu0 %v3311_v25  ;;  %v2532_v25 = vrot.slane %v2486_v15, %v4181_v46 }
 0x1b6   :  { %2847 = vmatprep.subr.bf16.mxu1 %v3313_v26  ;;  %2836 = vmatprep.mubr.bf16.mxu0 %v4009_v7 }
 0x1b7   :  { %2877 = vmatprep.mubr.bf16.mxu1 %v4009_v7  ;;  %v2520_v7 = vrot.slane %v4166_v48, %v2519_v62 }
 0x1b8   :  { %2807 = vmatpush1.bf16.msra.mxu0 %v3310_v52 }
 0x1b9   :  { %2848 = vmatpush1.bf16.msra.mxu1 %v3312_v31  ;;  %2808 = vmatprep.subr.bf16.mxu0 %v3319_v33 }
 0x1ba   :  { %2849 = vmatprep.subr.bf16.mxu1 %v3321_v34 }
 0x1bc   :  { %2809 = vmatpush1.bf16.msra.mxu0 %v3318_v35 }
 0x1bd   :  { %2850 = vmatpush1.bf16.msra.mxu1 %v3320_v36 }
 0x1bf   :  { %3324 = vmatmul.mubr.msk.bf16.vlgmr.msra.gmra.mrb[28].mxu0 %vm2718_vm1, %v2573_v22 }
 0x1c0   :  { %3325 = vmatmul.mubr.msk.bf16.vlgmr.msra.gmra.mrb[28].mxu1 %vm2718_vm1, %v2573_v22 }
 0x1d3   :  { %v2232_v37 = vpop.f32.mrb[8].mxu1 }
 0x1d4   :  { %v2234_v38 = vpop.f32.mrb[9].mxu1 }
 0x1d5   :  { %v2236_v39 = vpop.f32.mrb[10].mxu1 }
 0x1d6   :  { %v2237_v40 = vpop.f32.mrb[11].mxu1  ;;  %v2886_v39 = vld [vmem:[#allocation11] sm:$0xff] }
 0x1ea   :  { %v2191_v50 = vpop.f32.mrb[8].mxu0 }
 0x1eb   :  { %v2233_v54 = vadd.f32 %v2232_v37, %v2191_v50  ;;  %v2193_v55 = vpop.f32.mrb[9].mxu0 }
 0x1ec   :  { %v2235_v56 = vadd.f32 %v2234_v38, %v2193_v55  ;;  %v2195_v57 = vpop.f32.mrb[10].mxu0 }
 0x1ed   :  { %v2553_v58 = vadd.f32 %v2508_v47, %v2233_v54  ;;  %v2196_v59 = vpop.f32.mrb[11].mxu0 }
 0x1ee   :  { %v2554_v60 = vadd.f32 %v2512_v51, %v2235_v56 }
 0x1ef   :  { %2565 = vst [vmem:[#allocation13 + $0x20] sm:$0xff] %v2553_v58 }
 0x1f0   :  { %2566 = vst [vmem:[#allocation13 + $0x28] sm:$0xff] %v2554_v60 }
 0x212   :  { %v2314_v1 = vpop.f32.mrb[12].mxu0 }
 0x213   :  { %v2273_v0 = vpop.f32.mrb[12].mxu1  ;;  %v2316_v3 = vpop.f32.mrb[13].mxu0 }
 0x214   :  { %v2315_v44 = vadd.f32 %v2314_v1, %v2273_v0  ;;  %v2275_v2 = vpop.f32.mrb[13].mxu1  ;;  %v2318_v5 = vpop.f32.mrb[14].mxu0 }
 0x215   :  { %v2317_v4 = vadd.f32 %v2316_v3, %v2275_v2  ;;  %v2277_v32 = vpop.f32.mrb[14].mxu1  ;;  %v2319_v9 = vpop.f32.mrb[15].mxu0 }
 0x216   :  { %v2555_v6 = vadd.f32 %v2516_v63, %v2315_v44  ;;  %v2278_v8 = vpop.f32.mrb[15].mxu1 }
 0x217   :  { %v2556_v10 = vadd.f32 %v2520_v7, %v2317_v4 }
 0x218   :  { %2567 = vst [vmem:[#allocation13 + $0x30] sm:$0xff] %v2555_v6 }
 0x219   :  { %2568 = vst [vmem:[#allocation13 + $0x38] sm:$0xff] %v2556_v10 }
 0x23b   :  { %v2396_v11 = vpop.f32.mrb[16].mxu1 }
 0x23c   :  { %v2398_v12 = vpop.f32.mrb[17].mxu1 }
 0x23d   :  { %v2400_v13 = vpop.f32.mrb[18].mxu1 }
 0x23e   :  { %v2401_v14 = vpop.f32.mrb[19].mxu1 }
 0x252   :  { %v2355_v48 = vpop.f32.mrb[16].mxu0 }
 0x253   :  { %v2397_v18 = vadd.f32 %v2396_v11, %v2355_v48  ;;  %v2357_v19 = vpop.f32.mrb[17].mxu0 }
 0x254   :  { %v2399_v20 = vadd.f32 %v2398_v12, %v2357_v19  ;;  %v2359_v21 = vpop.f32.mrb[18].mxu0 }
 0x255   :  { %v2557_v22 = vadd.f32 %v2524_v16, %v2397_v18  ;;  %v2360_v23 = vpop.f32.mrb[19].mxu0 }
 0x256   :  { %v2558_v24 = vadd.f32 %v2528_v17, %v2399_v20 }
 0x257   :  { %2569 = vst [vmem:[#allocation13 + $0x40] sm:$0xff] %v2557_v22 }
 0x258   :  { %2570 = vst [vmem:[#allocation13 + $0x48] sm:$0xff] %v2558_v24 }
 0x27a   :  { %v2478_v27 = vpop.f32.mrb[20].mxu0 }
 0x27b   :  { %v2437_v26 = vpop.f32.mrb[20].mxu1  ;;  %v2480_v52 = vpop.f32.mrb[21].mxu0 }
 0x27c   :  { %v2479_v29 = vadd.f32 %v2478_v27, %v2437_v26  ;;  %v2439_v30 = vpop.f32.mrb[21].mxu1  ;;  %v2482_v34 = vpop.f32.mrb[22].mxu0 }
 0x27d   :  { %v2481_v31 = vadd.f32 %v2480_v52, %v2439_v30  ;;  %v2441_v33 = vpop.f32.mrb[22].mxu1  ;;  %v2483_v37 = vpop.f32.mrb[23].mxu0 }
 0x27e   :  { %v2559_v35 = vadd.f32 %v2532_v25, %v2479_v29  ;;  %v2442_v36 = vpop.f32.mrb[23].mxu1 }
 0x27f   :  { %v2560_v38 = vadd.f32 %v2536_v28, %v2481_v31 }
 0x280   :  { %2571 = vst [vmem:[#allocation13 + $0x50] sm:$0xff] %v2559_v35 }
 0x281   :  { %2572 = vst [vmem:[#allocation13 + $0x58] sm:$0xff] %v2560_v38 }
 0x282   :  { %3954 = shalt.err (!%p3951_p10)
}
 0x283   :  { %s3955_s25 = scalar_lea.hbm %s4258_s6, 1536 }
 0x284   :  { %p3956_p11 = scmp.ne.s32.totalorder %s4258_s6, %s3955_s25  ;;  %p3959_p12 = scmp.lt.u32.totalorder %s3955_s25, %s4258_s6 }
 0x286   :  { %p3961_p13 = pnand %p3959_p12, %p3956_p11 }
 0x288   :  { %3964 = shalt.err (!%p3961_p13)
}
 0x289   :  { %2953 = dma.vmem_to_hbm [thread:$0]  %s2951_s26, 1536, %s4258_s6, [#allocation4]   ;;  %v2891_v40 = vrot.slane %v2886_v39, %v4164_v45  ;;  %v2899_v47 = vrot.slane %v2886_v39, %v4181_v46  ;;  %v2895_v50 = vrot.slane %v2886_v39, %v4169_v49  ;;  %v2903_v51 = vrot.slane %v2886_v39, %v4184_v53  ;;  %v2756_v54 = vpop.f32.mrb[24].mxu0  ;;  %v2797_v55 = vpop.f32.mrb[24].mxu1 }
 0x28a   :  { %v2758_v58 = vpop.f32.mrb[25].mxu0  ;;  %v2799_v59 = vpop.f32.mrb[25].mxu1  ;;  %v2907_v49 = vrot.slane %v2886_v39, %v2507_v42  ;;  %v2915_v46 = vrot.slane %v2886_v39, %v2515_v61  ;;  %v2911_v53 = vrot.slane %v2886_v39, %v2511_v43  ;;  %v2919_v44 = vrot.slane %v2886_v39, %v2519_v62  ;;  %s4011_s6 = smov [#allocation14]  }
 0x28b   :  { %v2928_v56 = vadd.f32 %v2891_v40, %v2756_v54  ;;  %v2930_v57 = vadd.f32 %v2899_v47, %v2797_v55  ;;  %v2929_v60 = vadd.f32 %v2895_v50, %v2758_v58  ;;  %v2931_v63 = vadd.f32 %v2903_v51, %v2799_v59  ;;  %v2760_v0 = vpop.f32.mrb[26].mxu0  ;;  %v2801_v1 = vpop.f32.mrb[26].mxu1  ;;  %s2960_s10 = sshll.u32 %s4011_s6, 4  ;;  %s2961_s10 = int_to_ptr.vmem [resolvable:$true] %s2960_s10 }
 0x28c   :  { %v2761_v7 = vpop.f32.mrb[27].mxu0  ;;  %v2802_v45 = vpop.f32.mrb[27].mxu1  ;;  %s3965_s2 = scalar_lea.vmem %s2961_s10, 1024  ;;  %p3970_p1 = scmp.lt.s32.totalorder %s2961_s10, %s2961_s10 }
 0x28d   :  { %2936 = vst [vmem:[#allocation14] sm:$0xff] %v2928_v56  ;;  %2938 = vst [vmem:[#allocation14 + $0x10] sm:$0xff] %v2930_v57  ;;  %p3966_p0 = scmp.ne.s32.totalorder %s2961_s10, %s3965_s2  ;;  %p3971_p2 = scmp.lt.s32.totalorder %s3965_s2, %s3965_s2 }
 0x28e   :  { %2937 = vst [vmem:[#allocation14 + $0x8] sm:$0xff] %v2929_v60  ;;  %2939 = vst [vmem:[#allocation14 + $0x18] sm:$0xff] %v2931_v63 }
 0x28f   :  { %p3972_p3 = por %p3971_p2, %p3970_p1 }
 0x291   :  { %p3973_p4 = pnand %p3972_p3, %p3966_p0 }
 0x292   :  { %v2838_v2 = vpop.f32.mrb[28].mxu0 }
 0x293   :  { %v2879_v3 = vpop.f32.mrb[28].mxu1  ;;  %v2932_v4 = vadd.f32 %v2907_v49, %v2838_v2  ;;  %v2840_v5 = vpop.f32.mrb[29].mxu0 }
 0x294   :  { %v2934_v32 = vadd.f32 %v2915_v46, %v2879_v3  ;;  %v2881_v6 = vpop.f32.mrb[29].mxu1  ;;  %v2933_v8 = vadd.f32 %v2911_v53, %v2840_v5  ;;  %v2842_v42 = vpop.f32.mrb[30].mxu0 }
 0x295   :  { %v2935_v9 = vadd.f32 %v2919_v44, %v2881_v6  ;;  %v2883_v10 = vpop.f32.mrb[30].mxu1  ;;  %2940 = vst [vmem:[#allocation14 + $0x20] sm:$0xff] %v2932_v4  ;;  %v2843_v61 = vpop.f32.mrb[31].mxu0 }
 0x296   :  { %2942 = vst [vmem:[#allocation14 + $0x30] sm:$0xff] %v2934_v32  ;;  %v2884_v43 = vpop.f32.mrb[31].mxu1  ;;  %2941 = vst [vmem:[#allocation14 + $0x28] sm:$0xff] %v2933_v8 }
 0x297   :  { %2943 = vst [vmem:[#allocation14 + $0x38] sm:$0xff] %v2935_v9 }
 0x298   :  { %3976 = shalt.err (!%p3973_p4)
}
 0x299   :  { %s3977_s3 = scalar_lea.hbm %s4259_s7, 1024 }
 0x29a   :  { %p3978_p5 = scmp.ne.s32.totalorder %s4259_s7, %s3977_s3  ;;  %p3981_p6 = scmp.lt.u32.totalorder %s3977_s3, %s4259_s7 }
 0x29c   :  { %p3983_p7 = pnand %p3981_p6, %p3978_p5 }
 0x29e   :  { %3986 = shalt.err (!%p3983_p7)
}
 0x29f   :  { %2963 = dma.vmem_to_hbm [thread:$0]  %s2961_s10, 1024, %s4259_s7, [#allocation15]  }
 0x2a0   :  { %3995 = dma.done.wait [#allocation4], 1536  }
 0x2a1   :  { %3996 = vsyncadd [#allocation4], 4294965760 }
 0x2a2   :  { %3997 = dma.done.wait [#allocation15], 1024  }
 0x2a3   :  { %3998 = vsyncadd [#allocation15], 4294966272 }
 0x2a4   :  { %2970 = vsyncpa [#allocation3], 1 }
 0x2a5   :  { %2971 = vsyncpa [#allocation6], 1 }
 0x2a6   :  { %2972 = vsyncpa [#allocation9], 1 }
 0x2a7   :  { %2973 = vsyncpa [#allocation12], 1 }
 0x2a8   :  { %2974 = vsyncpa [#allocation4], 1 }
 0x2a9   :  { %2975 = vsyncpa [#allocation15], 1 }

</bundles_post_ra>
